<compile_context>
chip_gen: v7x
topology: tpu7x:2x2x1
jax: 0.10.0
libtpu: 0.0.40
codegen_flags: <defaults>
</compile_context>

<pallas_src>
import functools

import jax
import jax.numpy as jnp
from jax.experimental import pallas as pl
from jax.experimental.pallas import tpu as pltpu

COUT_PAD = 128  # lane-dense output width


def _round_up(x, m):
    return (x + m - 1) // m * m


# ---------------------------------------------------------------------------
# Pallas kernel: 2x2-tap accumulation matmul + bias + optional ReLU
#   xm_ref:  (TM, C4)    bf16  aligned "main" rows of the flattened s2d input
#   xh_ref:  (HALO, C4)  bf16  the next HALO rows (tap halo)
#   w_ref:   (4, C4, 128) bf16 per-tap weights (BN scale folded in)
#   b_ref:   (1, 128)    f32   BN bias (zero-padded to 128 lanes)
#   o_ref:   (TM, 128)   bf16  lane-dense output tile
#   xbuf:    (TM+HALO, C4) bf16 VMEM scratch: contiguous activation slab
# ---------------------------------------------------------------------------
def _tap_matmul_kernel(xm_ref, xh_ref, w_ref, b_ref, o_ref, xbuf_ref, *,
                       tm, offsets, apply_relu):
    # Assemble the contiguous (TM + HALO, C4) activation slab in VMEM.
    xbuf_ref[:tm, :] = xm_ref[...]
    xbuf_ref[tm:, :] = xh_ref[...]

    acc = None
    for t, off in enumerate(offsets):          # taps (di, dj): off = di*Ws + dj
        lhs = xbuf_ref[off:off + tm, :]        # static shifted slice of the slab
        contrib = jnp.dot(lhs, w_ref[t], preferred_element_type=jnp.float32)
        acc = contrib if acc is None else acc + contrib

    y = acc + b_ref[...]                       # fused (eval-mode) BN bias
    if apply_relu:
        y = jnp.maximum(y, 0.0)
    o_ref[...] = y.astype(o_ref.dtype)


# ---------------------------------------------------------------------------
# One Conv2dBN(3x3, stride=2, pad=1) (+ optional ReLU) layer.
# ---------------------------------------------------------------------------
def _conv3x3_s2_bn(x, w2, bias, cout, apply_relu):
    """x: (N, H, W, C) bf16 NHWC -> (N, H//2, W//2, cout) bf16."""
    n, h, w, c = x.shape
    assert h % 2 == 0 and w % 2 == 0, "even spatial dims expected"
    ho, wo = h // 2, w // 2
    hs, ws = ho + 1, wo + 1
    c4 = 4 * c

    # Zero-pad (conv padding=1) and space-to-depth by 2 -> (N, Hs, Ws, 4C).
    xp = jnp.pad(x, ((0, 0), (1, 1), (1, 1), (0, 0)))
    x2 = (xp.reshape(n, hs, 2, ws, 2, c)
            .transpose(0, 1, 3, 2, 4, 5)
            .reshape(n, hs, ws, c4))
    xf = x2.reshape(n, hs * ws, c4)            # flattened superpixel rows

    mo = ho * ws                               # output rows actually needed
    halo = _round_up(ws + 1, 128)              # tap offsets reach Ws+1 rows ahead
    tiles = max(1, min(max(512 // halo, 1), pl.cdiv(mo, halo)))
    tm = halo * tiles                          # M-tile (multiple of 128, <= ~512)
    mo_pad = _round_up(mo, tm)
    lp = mo_pad + halo
    xf = jnp.pad(xf, ((0, 0), (0, lp - hs * ws), (0, 0)))

    ratio = tm // halo
    grid = (n, mo_pad // tm)
    offsets = (0, 1, ws, ws + 1)               # flat offsets of the 4 taps

    kernel = functools.partial(_tap_matmul_kernel, tm=tm, offsets=offsets,
                               apply_relu=apply_relu)

    y = pl.pallas_call(
        kernel,
        out_shape=jax.ShapeDtypeStruct((n, mo_pad, COUT_PAD), jnp.bfloat16),
        grid=grid,
        in_specs=[
            # aligned main rows of this output tile
            pl.BlockSpec((None, tm, c4), lambda b, i: (b, i, 0)),
            # 128-row-aligned halo (the next HALO rows of the same array)
            pl.BlockSpec((None, halo, c4), lambda b, i: (b, (i + 1) * ratio, 0)),
            # packed per-tap weights, pinned
            pl.BlockSpec((4, c4, COUT_PAD), lambda b, i: (0, 0, 0)),
            # fused BN bias, pinned
            pl.BlockSpec((1, COUT_PAD), lambda b, i: (0, 0)),
        ],
        out_specs=pl.BlockSpec((None, tm, COUT_PAD), lambda b, i: (b, i, 0)),
        scratch_shapes=[pltpu.VMEM((tm + halo, c4), jnp.bfloat16)],
        compiler_params=pltpu.CompilerParams(
            dimension_semantics=("parallel", "parallel"),
            vmem_limit_bytes=32 * 1024 * 1024),
    )(xf, xf, w2, bias)

    # Strip the M padding, the lane padding, and the Ws-wrap garbage columns.
    y = y[:, :mo, :cout].reshape(n, ho, ws, cout)[:, :, :wo, :]
    return y


# ---------------------------------------------------------------------------
# Parameters (deterministic, mirrors Conv2dBN __init__) + kernel packing
# ---------------------------------------------------------------------------
def init_patch_embed_params(key, in_chans, embed_dim):
    """Raw per-layer params: (conv_weight (cout,cin,3,3), bn_scale, bn_bias)."""
    dims = [in_chans, embed_dim // 8, embed_dim // 4, embed_dim // 2, embed_dim]
    eps = 1e-5
    raw = []
    for i in range(4):
        key, sub = jax.random.split(key)
        cin, cout = dims[i], dims[i + 1]
        w_conv = jax.random.normal(sub, (cout, cin, 3, 3), jnp.float32)
        w_conv = w_conv * (1.0 / jnp.sqrt(jnp.float32(cin * 9)))
        # BatchNorm2d deterministic init: gamma=1 (bn_weight_init=1), beta=0,
        # running_mean=0, running_var=1.
        gamma = jnp.ones((cout,), jnp.float32)
        beta = jnp.zeros((cout,), jnp.float32)
        mean = jnp.zeros((cout,), jnp.float32)
        var = jnp.ones((cout,), jnp.float32)
        scale = gamma / jnp.sqrt(var + eps)
        bias = beta - mean * scale
        raw.append((w_conv, scale, bias))
    return raw


def pack_patch_embed_params(raw_params):
    """Fold BN scale into the conv weight and repack for the s2d kernel."""
    packed = []
    for (w_conv, scale, bias) in raw_params:
        cout, cin = w_conv.shape[0], w_conv.shape[1]
        wf = w_conv * scale[:, None, None, None]     # BN scale folded in
        # W2[di, dj, ph, pw, ci, co] = wf[co, ci, 2*di+ph, 2*dj+pw]  (else 0)
        w2 = jnp.zeros((2, 2, 2, 2, cin, COUT_PAD), jnp.float32)
        for di in range(2):
            for dj in range(2):
                for ph in range(2):
                    for pw in range(2):
                        kh, kw = 2 * di + ph, 2 * dj + pw
                        if kh <= 2 and kw <= 2:
                            w2 = w2.at[di, dj, ph, pw, :, :cout].set(
                                wf[:, :, kh, kw].T)
        w2 = w2.reshape(4, 4 * cin, COUT_PAD).astype(jnp.bfloat16)
        b2 = jnp.zeros((1, COUT_PAD), jnp.float32).at[0, :cout].set(bias)
        packed.append((w2, b2, cout))
    return packed


# ---------------------------------------------------------------------------
# PatchEmbed forward (NCHW in, NCHW out; bf16 activations internally)
# ---------------------------------------------------------------------------
def patch_embed_forward(x_nchw, packed_params):
    x = jnp.transpose(x_nchw, (0, 2, 3, 1)).astype(jnp.bfloat16)
    for i, (w2, b2, cout) in enumerate(packed_params):
        x = _conv3x3_s2_bn(x, w2, b2, cout, apply_relu=(i < 3))
    return jnp.transpose(x, (0, 3, 1, 2)).astype(jnp.float32)


def patch_embed_reference(x_nchw, raw_params):
    """Pure-XLA f32 reference for correctness checking."""
    x = x_nchw.astype(jnp.float32)
    for i, (w_conv, scale, bias) in enumerate(raw_params):
        x = jax.lax.conv_general_dilated(
            x, w_conv, window_strides=(2, 2), padding=((1, 1), (1, 1)),
            dimension_numbers=("NCHW", "OIHW", "NCHW"))
        x = x * scale[None, :, None, None] + bias[None, :, None, None]
        if i < 3:
            x = jnp.maximum(x, 0.0)
    return x


if __name__ == "__main__":
    key = jax.random.PRNGKey(0)
    k_x, k_p = jax.random.split(key)

    batch, in_chans, embed_dim, resolution = 2, 4, 32, 16
    x = jax.random.normal(k_x, (batch, in_chans, resolution, resolution),
                          jnp.float32)

    raw_params = init_patch_embed_params(k_p, in_chans, embed_dim)
    packed_params = pack_patch_embed_params(raw_params)

    fwd = jax.jit(lambda inp: patch_embed_forward(inp, packed_params))
    out = jax.block_until_ready(fwd(x))

    # 4 stride-2 convs: 16 -> 8 -> 4 -> 2 -> 1
    assert out.shape == (batch, embed_dim, resolution // 16, resolution // 16), out.shape
    assert bool(jnp.all(jnp.isfinite(out)))

    ref = jax.block_until_ready(patch_embed_reference(x, raw_params))
    rel_err = float(jnp.linalg.norm(out - ref) / (jnp.linalg.norm(ref) + 1e-6))
    assert rel_err < 5e-2, f"relative error too large: {rel_err}"

    print("KERNEL_OK")
</pallas_src>

<mosaic_0001>
module attributes {stable_mosaic.version = 11 : i64} {
  func.func @_tap_matmul_kernel(%arg0: i32, %arg1: i32, %arg2: memref<1x128x16xbf16, #tpu.memory_space<vmem>>, %arg3: memref<1x128x16xbf16, #tpu.memory_space<vmem>>, %arg4: memref<4x16x128xbf16, #tpu.memory_space<vmem>>, %arg5: memref<1x128xf32, #tpu.memory_space<vmem>>, %arg6: memref<1x128x128xbf16, #tpu.memory_space<vmem>>, %arg7: memref<256x16xbf16, #tpu.memory_space<vmem>>) attributes {dimension_semantics = [#tpu.dimension_semantics<parallel>, #tpu.dimension_semantics<parallel>], iteration_bounds = array<i64: 2, 1>, scalar_prefetch = 0 : i64, scratch_operands = 1 : i64, tpu.core_type = #tpu.core_type<tc>, window_params = [{transform_indices = @transform_0, window_bounds = array<i64: 1, 128, 16>}, {transform_indices = @transform_1, window_bounds = array<i64: 1, 128, 16>}, {pipeline_mode = #tpu.pipeline_mode<synchronous>, transform_indices = @transform_2, window_bounds = array<i64: 4, 16, 128>}, {pipeline_mode = #tpu.pipeline_mode<synchronous>, transform_indices = @transform_3, window_bounds = array<i64: 1, 128>}, {transform_indices = @transform_4, window_bounds = array<i64: 1, 128, 128>}]} {
    %c0 = arith.constant 0 : index
    %c0_0 = arith.constant 0 : index
    %c0_1 = arith.constant 0 : index
    %0 = vector.load %arg2[%c0, %c0_0, %c0_1] : memref<1x128x16xbf16, #tpu.memory_space<vmem>>, vector<1x128x16xbf16>
    %1 = vector.shape_cast %0 : vector<1x128x16xbf16> to vector<128x16xbf16>
    %c0_2 = arith.constant 0 : index
    %c0_3 = arith.constant 0 : index
    %2 = vector.load %arg7[%c0_2, %c0_3] : memref<256x16xbf16, #tpu.memory_space<vmem>>, vector<128x16xbf16>
    tpu.vector_store %arg7[%c0_2, %c0_3], %1 {strides = array<i32>} : memref<256x16xbf16, #tpu.memory_space<vmem>>, vector<128x16xbf16>,
    %c0_4 = arith.constant 0 : index
    %c0_5 = arith.constant 0 : index
    %c0_6 = arith.constant 0 : index
    %3 = vector.load %arg3[%c0_4, %c0_5, %c0_6] : memref<1x128x16xbf16, #tpu.memory_space<vmem>>, vector<1x128x16xbf16>
    %4 = vector.shape_cast %3 : vector<1x128x16xbf16> to vector<128x16xbf16>
    %c128 = arith.constant 128 : index
    %c0_7 = arith.constant 0 : index
    %5 = vector.load %arg7[%c128, %c0_7] : memref<256x16xbf16, #tpu.memory_space<vmem>>, vector<128x16xbf16>
    tpu.vector_store %arg7[%c128, %c0_7], %4 {strides = array<i32>} : memref<256x16xbf16, #tpu.memory_space<vmem>>, vector<128x16xbf16>,
    %c0_8 = arith.constant 0 : index
    %c0_9 = arith.constant 0 : index
    %6 = vector.load %arg7[%c0_8, %c0_9] : memref<256x16xbf16, #tpu.memory_space<vmem>>, vector<128x16xbf16>
    %c0_10 = arith.constant 0 : index
    %c0_11 = arith.constant 0 : index
    %c0_12 = arith.constant 0 : index
    %7 = vector.load %arg4[%c0_10, %c0_11, %c0_12] : memref<4x16x128xbf16, #tpu.memory_space<vmem>>, vector<1x16x128xbf16>
    %8 = vector.shape_cast %7 : vector<1x16x128xbf16> to vector<16x128xbf16>
    %cst = arith.constant dense<0.000000e+00> : vector<128x128xf32>
    %9 = tpu.matmul %6, %8, %cst {dimension_numbers = #tpu.dot_dimension_numbers<[1], [0], [0], [1], [0, 0, 1, 1], [], []>} : vector<128x16xbf16>, vector<16x128xbf16>, vector<128x128xf32> -> vector<128x128xf32>
    %c1 = arith.constant 1 : index
    %c0_13 = arith.constant 0 : index
    %10 = vector.load %arg7[%c1, %c0_13] : memref<256x16xbf16, #tpu.memory_space<vmem>>, vector<128x16xbf16>
    %c1_14 = arith.constant 1 : index
    %c0_15 = arith.constant 0 : index
    %c0_16 = arith.constant 0 : index
    %11 = vector.load %arg4[%c1_14, %c0_15, %c0_16] : memref<4x16x128xbf16, #tpu.memory_space<vmem>>, vector<1x16x128xbf16>
    %12 = vector.shape_cast %11 : vector<1x16x128xbf16> to vector<16x128xbf16>
    %cst_17 = arith.constant dense<0.000000e+00> : vector<128x128xf32>
    %13 = tpu.matmul %10, %12, %cst_17 {dimension_numbers = #tpu.dot_dimension_numbers<[1], [0], [0], [1], [0, 0, 1, 1], [], []>} : vector<128x16xbf16>, vector<16x128xbf16>, vector<128x128xf32> -> vector<128x128xf32>
    %14 = arith.addf %9, %13 : vector<128x128xf32>
    %c9 = arith.constant 9 : index
    %c0_18 = arith.constant 0 : index
    %15 = vector.load %arg7[%c9, %c0_18] : memref<256x16xbf16, #tpu.memory_space<vmem>>, vector<128x16xbf16>
    %c2 = arith.constant 2 : index
    %c0_19 = arith.constant 0 : index
    %c0_20 = arith.constant 0 : index
    %16 = vector.load %arg4[%c2, %c0_19, %c0_20] : memref<4x16x128xbf16, #tpu.memory_space<vmem>>, vector<1x16x128xbf16>
    %17 = vector.shape_cast %16 : vector<1x16x128xbf16> to vector<16x128xbf16>
    %cst_21 = arith.constant dense<0.000000e+00> : vector<128x128xf32>
    %18 = tpu.matmul %15, %17, %cst_21 {dimension_numbers = #tpu.dot_dimension_numbers<[1], [0], [0], [1], [0, 0, 1, 1], [], []>} : vector<128x16xbf16>, vector<16x128xbf16>, vector<128x128xf32> -> vector<128x128xf32>
    %19 = arith.addf %14, %18 : vector<128x128xf32>
    %c10 = arith.constant 10 : index
    %c0_22 = arith.constant 0 : index
    %20 = vector.load %arg7[%c10, %c0_22] : memref<256x16xbf16, #tpu.memory_space<vmem>>, vector<128x16xbf16>
    %c3 = arith.constant 3 : index
    %c0_23 = arith.constant 0 : index
    %c0_24 = arith.constant 0 : index
    %21 = vector.load %arg4[%c3, %c0_23, %c0_24] : memref<4x16x128xbf16, #tpu.memory_space<vmem>>, vector<1x16x128xbf16>
    %22 = vector.shape_cast %21 : vector<1x16x128xbf16> to vector<16x128xbf16>
    %cst_25 = arith.constant dense<0.000000e+00> : vector<128x128xf32>
    %23 = tpu.matmul %20, %22, %cst_25 {dimension_numbers = #tpu.dot_dimension_numbers<[1], [0], [0], [1], [0, 0, 1, 1], [], []>} : vector<128x16xbf16>, vector<16x128xbf16>, vector<128x128xf32> -> vector<128x128xf32>
    %24 = arith.addf %19, %23 : vector<128x128xf32>
    %c0_26 = arith.constant 0 : index
    %c0_27 = arith.constant 0 : index
    %25 = vector.load %arg5[%c0_26, %c0_27] : memref<1x128xf32, #tpu.memory_space<vmem>>, vector<1x128xf32>
    %26 = vector.broadcast %25 : vector<1x128xf32> to vector<128x128xf32>
    %27 = arith.addf %24, %26 : vector<128x128xf32>
    %cst_28 = arith.constant 0.000000e+00 : f32
    %28 = vector.broadcast %cst_28 : f32 to vector<128x128xf32>
    %29 = arith.maximumf %27, %28 : vector<128x128xf32>
    %30 = arith.truncf %29 : vector<128x128xf32> to vector<128x128xbf16>
    %c0_29 = arith.constant 0 : index
    %c0_30 = arith.constant 0 : index
    %c0_31 = arith.constant 0 : index
    %31 = vector.load %arg6[%c0_29, %c0_30, %c0_31] : memref<1x128x128xbf16, #tpu.memory_space<vmem>>, vector<1x128x128xbf16>
    %32 = vector.shape_cast %31 : vector<1x128x128xbf16> to vector<128x128xbf16>
    %33 = vector.shape_cast %30 : vector<128x128xbf16> to vector<1x128x128xbf16>
    tpu.vector_store %arg6[%c0_29, %c0_30, %c0_31], %33 {strides = array<i32>} : memref<1x128x128xbf16, #tpu.memory_space<vmem>>, vector<1x128x128xbf16>,
    return
  }
  func.func @transform_0(%arg0: i32, %arg1: i32) -> (i32, i32, i32) {
    %c0_i32 = arith.constant 0 : i32
    %c0_i32_0 = arith.constant 0 : i32
    return %arg0, %arg1, %c0_i32 : i32, i32, i32
  }
  func.func @transform_1(%arg0: i32, %arg1: i32) -> (i32, i32, i32) {
    %c1_i32 = arith.constant 1 : i32
    %0 = arith.addi %arg1, %c1_i32 : i32
    %c1_i32_0 = arith.constant 1 : i32
    %1 = arith.muli %0, %c1_i32_0 : i32
    %c0_i32 = arith.constant 0 : i32
    %c0_i32_1 = arith.constant 0 : i32
    return %arg0, %1, %c0_i32 : i32, i32, i32
  }
  func.func @transform_2(%arg0: i32, %arg1: i32) -> (i32, i32, i32) {
    %c0_i32 = arith.constant 0 : i32
    %c0_i32_0 = arith.constant 0 : i32
    %c0_i32_1 = arith.constant 0 : i32
    %c0_i32_2 = arith.constant 0 : i32
    return %c0_i32, %c0_i32_0, %c0_i32_1 : i32, i32, i32
  }
  func.func @transform_3(%arg0: i32, %arg1: i32) -> (i32, i32) {
    %c0_i32 = arith.constant 0 : i32
    %c0_i32_0 = arith.constant 0 : i32
    %c0_i32_1 = arith.constant 0 : i32
    return %c0_i32, %c0_i32_0 : i32, i32
  }
  func.func @transform_4(%arg0: i32, %arg1: i32) -> (i32, i32, i32) {
    %c0_i32 = arith.constant 0 : i32
    %c0_i32_0 = arith.constant 0 : i32
    return %arg0, %arg1, %c0_i32 : i32, i32, i32
  }
}

module attributes {stable_mosaic.version = 11 : i64} {
  func.func @_tap_matmul_kernel(%arg0: i32, %arg1: i32, %arg2: memref<1x128x16xbf16, #tpu.memory_space<vmem>>, %arg3: memref<1x128x16xbf16, #tpu.memory_space<vmem>>, %arg4: memref<4x16x128xbf16, #tpu.memory_space<vmem>>, %arg5: memref<1x128xf32, #tpu.memory_space<vmem>>, %arg6: memref<1x128x128xbf16, #tpu.memory_space<vmem>>, %arg7: memref<256x16xbf16, #tpu.memory_space<vmem>>) attributes {dimension_semantics = [#tpu.dimension_semantics<parallel>, #tpu.dimension_semantics<parallel>], iteration_bounds = array<i64: 2, 1>, scalar_prefetch = 0 : i64, scratch_operands = 1 : i64, tpu.core_type = #tpu.core_type<tc>, window_params = [{transform_indices = @transform_0, window_bounds = array<i64: 1, 128, 16>}, {transform_indices = @transform_1, window_bounds = array<i64: 1, 128, 16>}, {pipeline_mode = #tpu.pipeline_mode<synchronous>, transform_indices = @transform_2, window_bounds = array<i64: 4, 16, 128>}, {pipeline_mode = #tpu.pipeline_mode<synchronous>, transform_indices = @transform_3, window_bounds = array<i64: 1, 128>}, {transform_indices = @transform_4, window_bounds = array<i64: 1, 128, 128>}]} {
    %c0 = arith.constant 0 : index
    %c0_0 = arith.constant 0 : index
    %c0_1 = arith.constant 0 : index
    %0 = vector.load %arg2[%c0, %c0_0, %c0_1] : memref<1x128x16xbf16, #tpu.memory_space<vmem>>, vector<1x128x16xbf16>
    %1 = vector.shape_cast %0 : vector<1x128x16xbf16> to vector<128x16xbf16>
    %c0_2 = arith.constant 0 : index
    %c0_3 = arith.constant 0 : index
    %2 = vector.load %arg7[%c0_2, %c0_3] : memref<256x16xbf16, #tpu.memory_space<vmem>>, vector<128x16xbf16>
    tpu.vector_store %arg7[%c0_2, %c0_3], %1 {strides = array<i32>} : memref<256x16xbf16, #tpu.memory_space<vmem>>, vector<128x16xbf16>,
    %c0_4 = arith.constant 0 : index
    %c0_5 = arith.constant 0 : index
    %c0_6 = arith.constant 0 : index
    %3 = vector.load %arg3[%c0_4, %c0_5, %c0_6] : memref<1x128x16xbf16, #tpu.memory_space<vmem>>, vector<1x128x16xbf16>
    %4 = vector.shape_cast %3 : vector<1x128x16xbf16> to vector<128x16xbf16>
    %c128 = arith.constant 128 : index
    %c0_7 = arith.constant 0 : index
    %5 = vector.load %arg7[%c128, %c0_7] : memref<256x16xbf16, #tpu.memory_space<vmem>>, vector<128x16xbf16>
    tpu.vector_store %arg7[%c128, %c0_7], %4 {strides = array<i32>} : memref<256x16xbf16, #tpu.memory_space<vmem>>, vector<128x16xbf16>,
    %c0_8 = arith.constant 0 : index
    %c0_9 = arith.constant 0 : index
    %6 = vector.load %arg7[%c0_8, %c0_9] : memref<256x16xbf16, #tpu.memory_space<vmem>>, vector<128x16xbf16>
    %c0_10 = arith.constant 0 : index
    %c0_11 = arith.constant 0 : index
    %c0_12 = arith.constant 0 : index
    %7 = vector.load %arg4[%c0_10, %c0_11, %c0_12] : memref<4x16x128xbf16, #tpu.memory_space<vmem>>, vector<1x16x128xbf16>
    %8 = vector.shape_cast %7 : vector<1x16x128xbf16> to vector<16x128xbf16>
    %cst = arith.constant dense<0.000000e+00> : vector<128x128xf32>
    %9 = tpu.matmul %6, %8, %cst {dimension_numbers = #tpu.dot_dimension_numbers<[1], [0], [0], [1], [0, 0, 1, 1], [], []>} : vector<128x16xbf16>, vector<16x128xbf16>, vector<128x128xf32> -> vector<128x128xf32>
    %c1 = arith.constant 1 : index
    %c0_13 = arith.constant 0 : index
    %10 = vector.load %arg7[%c1, %c0_13] : memref<256x16xbf16, #tpu.memory_space<vmem>>, vector<128x16xbf16>
    %c1_14 = arith.constant 1 : index
    %c0_15 = arith.constant 0 : index
    %c0_16 = arith.constant 0 : index
    %11 = vector.load %arg4[%c1_14, %c0_15, %c0_16] : memref<4x16x128xbf16, #tpu.memory_space<vmem>>, vector<1x16x128xbf16>
    %12 = vector.shape_cast %11 : vector<1x16x128xbf16> to vector<16x128xbf16>
    %cst_17 = arith.constant dense<0.000000e+00> : vector<128x128xf32>
    %13 = tpu.matmul %10, %12, %cst_17 {dimension_numbers = #tpu.dot_dimension_numbers<[1], [0], [0], [1], [0, 0, 1, 1], [], []>} : vector<128x16xbf16>, vector<16x128xbf16>, vector<128x128xf32> -> vector<128x128xf32>
    %14 = arith.addf %9, %13 : vector<128x128xf32>
    %c5 = arith.constant 5 : index
    %c0_18 = arith.constant 0 : index
    %15 = vector.load %arg7[%c5, %c0_18] : memref<256x16xbf16, #tpu.memory_space<vmem>>, vector<128x16xbf16>
    %c2 = arith.constant 2 : index
    %c0_19 = arith.constant 0 : index
    %c0_20 = arith.constant 0 : index
    %16 = vector.load %arg4[%c2, %c0_19, %c0_20] : memref<4x16x128xbf16, #tpu.memory_space<vmem>>, vector<1x16x128xbf16>
    %17 = vector.shape_cast %16 : vector<1x16x128xbf16> to vector<16x128xbf16>
    %cst_21 = arith.constant dense<0.000000e+00> : vector<128x128xf32>
    %18 = tpu.matmul %15, %17, %cst_21 {dimension_numbers = #tpu.dot_dimension_numbers<[1], [0], [0], [1], [0, 0, 1, 1], [], []>} : vector<128x16xbf16>, vector<16x128xbf16>, vector<128x128xf32> -> vector<128x128xf32>
    %19 = arith.addf %14, %18 : vector<128x128xf32>
    %c6 = arith.constant 6 : index
    %c0_22 = arith.constant 0 : index
    %20 = vector.load %arg7[%c6, %c0_22] : memref<256x16xbf16, #tpu.memory_space<vmem>>, vector<128x16xbf16>
    %c3 = arith.constant 3 : index
    %c0_23 = arith.constant 0 : index
    %c0_24 = arith.constant 0 : index
    %21 = vector.load %arg4[%c3, %c0_23, %c0_24] : memref<4x16x128xbf16, #tpu.memory_space<vmem>>, vector<1x16x128xbf16>
    %22 = vector.shape_cast %21 : vector<1x16x128xbf16> to vector<16x128xbf16>
    %cst_25 = arith.constant dense<0.000000e+00> : vector<128x128xf32>
    %23 = tpu.matmul %20, %22, %cst_25 {dimension_numbers = #tpu.dot_dimension_numbers<[1], [0], [0], [1], [0, 0, 1, 1], [], []>} : vector<128x16xbf16>, vector<16x128xbf16>, vector<128x128xf32> -> vector<128x128xf32>
    %24 = arith.addf %19, %23 : vector<128x128xf32>
    %c0_26 = arith.constant 0 : index
    %c0_27 = arith.constant 0 : index
    %25 = vector.load %arg5[%c0_26, %c0_27] : memref<1x128xf32, #tpu.memory_space<vmem>>, vector<1x128xf32>
    %26 = vector.broadcast %25 : vector<1x128xf32> to vector<128x128xf32>
    %27 = arith.addf %24, %26 : vector<128x128xf32>
    %cst_28 = arith.constant 0.000000e+00 : f32
    %28 = vector.broadcast %cst_28 : f32 to vector<128x128xf32>
    %29 = arith.maximumf %27, %28 : vector<128x128xf32>
    %30 = arith.truncf %29 : vector<128x128xf32> to vector<128x128xbf16>
    %c0_29 = arith.constant 0 : index
    %c0_30 = arith.constant 0 : index
    %c0_31 = arith.constant 0 : index
    %31 = vector.load %arg6[%c0_29, %c0_30, %c0_31] : memref<1x128x128xbf16, #tpu.memory_space<vmem>>, vector<1x128x128xbf16>
    %32 = vector.shape_cast %31 : vector<1x128x128xbf16> to vector<128x128xbf16>
    %33 = vector.shape_cast %30 : vector<128x128xbf16> to vector<1x128x128xbf16>
    tpu.vector_store %arg6[%c0_29, %c0_30, %c0_31], %33 {strides = array<i32>} : memref<1x128x128xbf16, #tpu.memory_space<vmem>>, vector<1x128x128xbf16>,
    return
  }
  func.func @transform_0(%arg0: i32, %arg1: i32) -> (i32, i32, i32) {
    %c0_i32 = arith.constant 0 : i32
    %c0_i32_0 = arith.constant 0 : i32
    return %arg0, %arg1, %c0_i32 : i32, i32, i32
  }
  func.func @transform_1(%arg0: i32, %arg1: i32) -> (i32, i32, i32) {
    %c1_i32 = arith.constant 1 : i32
    %0 = arith.addi %arg1, %c1_i32 : i32
    %c1_i32_0 = arith.constant 1 : i32
    %1 = arith.muli %0, %c1_i32_0 : i32
    %c0_i32 = arith.constant 0 : i32
    %c0_i32_1 = arith.constant 0 : i32
    return %arg0, %1, %c0_i32 : i32, i32, i32
  }
  func.func @transform_2(%arg0: i32, %arg1: i32) -> (i32, i32, i32) {
    %c0_i32 = arith.constant 0 : i32
    %c0_i32_0 = arith.constant 0 : i32
    %c0_i32_1 = arith.constant 0 : i32
    %c0_i32_2 = arith.constant 0 : i32
    return %c0_i32, %c0_i32_0, %c0_i32_1 : i32, i32, i32
  }
  func.func @transform_3(%arg0: i32, %arg1: i32) -> (i32, i32) {
    %c0_i32 = arith.constant 0 : i32
    %c0_i32_0 = arith.constant 0 : i32
    %c0_i32_1 = arith.constant 0 : i32
    return %c0_i32, %c0_i32_0 : i32, i32
  }
  func.func @transform_4(%arg0: i32, %arg1: i32) -> (i32, i32, i32) {
    %c0_i32 = arith.constant 0 : i32
    %c0_i32_0 = arith.constant 0 : i32
    return %arg0, %arg1, %c0_i32 : i32, i32, i32
  }
}

module attributes {stable_mosaic.version = 11 : i64} {
  func.func @_tap_matmul_kernel(%arg0: i32, %arg1: i32, %arg2: memref<1x128x32xbf16, #tpu.memory_space<vmem>>, %arg3: memref<1x128x32xbf16, #tpu.memory_space<vmem>>, %arg4: memref<4x32x128xbf16, #tpu.memory_space<vmem>>, %arg5: memref<1x128xf32, #tpu.memory_space<vmem>>, %arg6: memref<1x128x128xbf16, #tpu.memory_space<vmem>>, %arg7: memref<256x32xbf16, #tpu.memory_space<vmem>>) attributes {dimension_semantics = [#tpu.dimension_semantics<parallel>, #tpu.dimension_semantics<parallel>], iteration_bounds = array<i64: 2, 1>, scalar_prefetch = 0 : i64, scratch_operands = 1 : i64, tpu.core_type = #tpu.core_type<tc>, window_params = [{transform_indices = @transform_0, window_bounds = array<i64: 1, 128, 32>}, {transform_indices = @transform_1, window_bounds = array<i64: 1, 128, 32>}, {pipeline_mode = #tpu.pipeline_mode<synchronous>, transform_indices = @transform_2, window_bounds = array<i64: 4, 32, 128>}, {pipeline_mode = #tpu.pipeline_mode<synchronous>, transform_indices = @transform_3, window_bounds = array<i64: 1, 128>}, {transform_indices = @transform_4, window_bounds = array<i64: 1, 128, 128>}]} {
    %c0 = arith.constant 0 : index
    %c0_0 = arith.constant 0 : index
    %c0_1 = arith.constant 0 : index
    %0 = vector.load %arg2[%c0, %c0_0, %c0_1] : memref<1x128x32xbf16, #tpu.memory_space<vmem>>, vector<1x128x32xbf16>
    %1 = vector.shape_cast %0 : vector<1x128x32xbf16> to vector<128x32xbf16>
    %c0_2 = arith.constant 0 : index
    %c0_3 = arith.constant 0 : index
    %2 = vector.load %arg7[%c0_2, %c0_3] : memref<256x32xbf16, #tpu.memory_space<vmem>>, vector<128x32xbf16>
    tpu.vector_store %arg7[%c0_2, %c0_3], %1 {strides = array<i32>} : memref<256x32xbf16, #tpu.memory_space<vmem>>, vector<128x32xbf16>,
    %c0_4 = arith.constant 0 : index
    %c0_5 = arith.constant 0 : index
    %c0_6 = arith.constant 0 : index
    %3 = vector.load %arg3[%c0_4, %c0_5, %c0_6] : memref<1x128x32xbf16, #tpu.memory_space<vmem>>, vector<1x128x32xbf16>
    %4 = vector.shape_cast %3 : vector<1x128x32xbf16> to vector<128x32xbf16>
    %c128 = arith.constant 128 : index
    %c0_7 = arith.constant 0 : index
    %5 = vector.load %arg7[%c128, %c0_7] : memref<256x32xbf16, #tpu.memory_space<vmem>>, vector<128x32xbf16>
    tpu.vector_store %arg7[%c128, %c0_7], %4 {strides = array<i32>} : memref<256x32xbf16, #tpu.memory_space<vmem>>, vector<128x32xbf16>,
    %c0_8 = arith.constant 0 : index
    %c0_9 = arith.constant 0 : index
    %6 = vector.load %arg7[%c0_8, %c0_9] : memref<256x32xbf16, #tpu.memory_space<vmem>>, vector<128x32xbf16>
    %c0_10 = arith.constant 0 : index
    %c0_11 = arith.constant 0 : index
    %c0_12 = arith.constant 0 : index
    %7 = vector.load %arg4[%c0_10, %c0_11, %c0_12] : memref<4x32x128xbf16, #tpu.memory_space<vmem>>, vector<1x32x128xbf16>
    %8 = vector.shape_cast %7 : vector<1x32x128xbf16> to vector<32x128xbf16>
    %cst = arith.constant dense<0.000000e+00> : vector<128x128xf32>
    %9 = tpu.matmul %6, %8, %cst {dimension_numbers = #tpu.dot_dimension_numbers<[1], [0], [0], [1], [0, 0, 1, 1], [], []>} : vector<128x32xbf16>, vector<32x128xbf16>, vector<128x128xf32> -> vector<128x128xf32>
    %c1 = arith.constant 1 : index
    %c0_13 = arith.constant 0 : index
    %10 = vector.load %arg7[%c1, %c0_13] : memref<256x32xbf16, #tpu.memory_space<vmem>>, vector<128x32xbf16>
    %c1_14 = arith.constant 1 : index
    %c0_15 = arith.constant 0 : index
    %c0_16 = arith.constant 0 : index
    %11 = vector.load %arg4[%c1_14, %c0_15, %c0_16] : memref<4x32x128xbf16, #tpu.memory_space<vmem>>, vector<1x32x128xbf16>
    %12 = vector.shape_cast %11 : vector<1x32x128xbf16> to vector<32x128xbf16>
    %cst_17 = arith.constant dense<0.000000e+00> : vector<128x128xf32>
    %13 = tpu.matmul %10, %12, %cst_17 {dimension_numbers = #tpu.dot_dimension_numbers<[1], [0], [0], [1], [0, 0, 1, 1], [], []>} : vector<128x32xbf16>, vector<32x128xbf16>, vector<128x128xf32> -> vector<128x128xf32>
    %14 = arith.addf %9, %13 : vector<128x128xf32>
    %c3 = arith.constant 3 : index
    %c0_18 = arith.constant 0 : index
    %15 = vector.load %arg7[%c3, %c0_18] : memref<256x32xbf16, #tpu.memory_space<vmem>>, vector<128x32xbf16>
    %c2 = arith.constant 2 : index
    %c0_19 = arith.constant 0 : index
    %c0_20 = arith.constant 0 : index
    %16 = vector.load %arg4[%c2, %c0_19, %c0_20] : memref<4x32x128xbf16, #tpu.memory_space<vmem>>, vector<1x32x128xbf16>
    %17 = vector.shape_cast %16 : vector<1x32x128xbf16> to vector<32x128xbf16>
    %cst_21 = arith.constant dense<0.000000e+00> : vector<128x128xf32>
    %18 = tpu.matmul %15, %17, %cst_21 {dimension_numbers = #tpu.dot_dimension_numbers<[1], [0], [0], [1], [0, 0, 1, 1], [], []>} : vector<128x32xbf16>, vector<32x128xbf16>, vector<128x128xf32> -> vector<128x128xf32>
    %19 = arith.addf %14, %18 : vector<128x128xf32>
    %c4 = arith.constant 4 : index
    %c0_22 = arith.constant 0 : index
    %20 = vector.load %arg7[%c4, %c0_22] : memref<256x32xbf16, #tpu.memory_space<vmem>>, vector<128x32xbf16>
    %c3_23 = arith.constant 3 : index
    %c0_24 = arith.constant 0 : index
    %c0_25 = arith.constant 0 : index
    %21 = vector.load %arg4[%c3_23, %c0_24, %c0_25] : memref<4x32x128xbf16, #tpu.memory_space<vmem>>, vector<1x32x128xbf16>
    %22 = vector.shape_cast %21 : vector<1x32x128xbf16> to vector<32x128xbf16>
    %cst_26 = arith.constant dense<0.000000e+00> : vector<128x128xf32>
    %23 = tpu.matmul %20, %22, %cst_26 {dimension_numbers = #tpu.dot_dimension_numbers<[1], [0], [0], [1], [0, 0, 1, 1], [], []>} : vector<128x32xbf16>, vector<32x128xbf16>, vector<128x128xf32> -> vector<128x128xf32>
    %24 = arith.addf %19, %23 : vector<128x128xf32>
    %c0_27 = arith.constant 0 : index
    %c0_28 = arith.constant 0 : index
    %25 = vector.load %arg5[%c0_27, %c0_28] : memref<1x128xf32, #tpu.memory_space<vmem>>, vector<1x128xf32>
    %26 = vector.broadcast %25 : vector<1x128xf32> to vector<128x128xf32>
    %27 = arith.addf %24, %26 : vector<128x128xf32>
    %cst_29 = arith.constant 0.000000e+00 : f32
    %28 = vector.broadcast %cst_29 : f32 to vector<128x128xf32>
    %29 = arith.maximumf %27, %28 : vector<128x128xf32>
    %30 = arith.truncf %29 : vector<128x128xf32> to vector<128x128xbf16>
    %c0_30 = arith.constant 0 : index
    %c0_31 = arith.constant 0 : index
    %c0_32 = arith.constant 0 : index
    %31 = vector.load %arg6[%c0_30, %c0_31, %c0_32] : memref<1x128x128xbf16, #tpu.memory_space<vmem>>, vector<1x128x128xbf16>
    %32 = vector.shape_cast %31 : vector<1x128x128xbf16> to vector<128x128xbf16>
    %33 = vector.shape_cast %30 : vector<128x128xbf16> to vector<1x128x128xbf16>
    tpu.vector_store %arg6[%c0_30, %c0_31, %c0_32], %33 {strides = array<i32>} : memref<1x128x128xbf16, #tpu.memory_space<vmem>>, vector<1x128x128xbf16>,
    return
  }
  func.func @transform_0(%arg0: i32, %arg1: i32) -> (i32, i32, i32) {
    %c0_i32 = arith.constant 0 : i32
    %c0_i32_0 = arith.constant 0 : i32
    return %arg0, %arg1, %c0_i32 : i32, i32, i32
  }
  func.func @transform_1(%arg0: i32, %arg1: i32) -> (i32, i32, i32) {
    %c1_i32 = arith.constant 1 : i32
    %0 = arith.addi %arg1, %c1_i32 : i32
    %c1_i32_0 = arith.constant 1 : i32
    %1 = arith.muli %0, %c1_i32_0 : i32
    %c0_i32 = arith.constant 0 : i32
    %c0_i32_1 = arith.constant 0 : i32
    return %arg0, %1, %c0_i32 : i32, i32, i32
  }
  func.func @transform_2(%arg0: i32, %arg1: i32) -> (i32, i32, i32) {
    %c0_i32 = arith.constant 0 : i32
    %c0_i32_0 = arith.constant 0 : i32
    %c0_i32_1 = arith.constant 0 : i32
    %c0_i32_2 = arith.constant 0 : i32
    return %c0_i32, %c0_i32_0, %c0_i32_1 : i32, i32, i32
  }
  func.func @transform_3(%arg0: i32, %arg1: i32) -> (i32, i32) {
    %c0_i32 = arith.constant 0 : i32
    %c0_i32_0 = arith.constant 0 : i32
    %c0_i32_1 = arith.constant 0 : i32
    return %c0_i32, %c0_i32_0 : i32, i32
  }
  func.func @transform_4(%arg0: i32, %arg1: i32) -> (i32, i32, i32) {
    %c0_i32 = arith.constant 0 : i32
    %c0_i32_0 = arith.constant 0 : i32
    return %arg0, %arg1, %c0_i32 : i32, i32, i32
  }
}

module attributes {stable_mosaic.version = 11 : i64} {
  func.func @_tap_matmul_kernel(%arg0: i32, %arg1: i32, %arg2: memref<1x128x64xbf16, #tpu.memory_space<vmem>>, %arg3: memref<1x128x64xbf16, #tpu.memory_space<vmem>>, %arg4: memref<4x64x128xbf16, #tpu.memory_space<vmem>>, %arg5: memref<1x128xf32, #tpu.memory_space<vmem>>, %arg6: memref<1x128x128xbf16, #tpu.memory_space<vmem>>, %arg7: memref<256x64xbf16, #tpu.memory_space<vmem>>) attributes {dimension_semantics = [#tpu.dimension_semantics<parallel>, #tpu.dimension_semantics<parallel>], iteration_bounds = array<i64: 2, 1>, scalar_prefetch = 0 : i64, scratch_operands = 1 : i64, tpu.core_type = #tpu.core_type<tc>, window_params = [{transform_indices = @transform_0, window_bounds = array<i64: 1, 128, 64>}, {transform_indices = @transform_1, window_bounds = array<i64: 1, 128, 64>}, {pipeline_mode = #tpu.pipeline_mode<synchronous>, transform_indices = @transform_2, window_bounds = array<i64: 4, 64, 128>}, {pipeline_mode = #tpu.pipeline_mode<synchronous>, transform_indices = @transform_3, window_bounds = array<i64: 1, 128>}, {transform_indices = @transform_4, window_bounds = array<i64: 1, 128, 128>}]} {
    %c0 = arith.constant 0 : index
    %c0_0 = arith.constant 0 : index
    %c0_1 = arith.constant 0 : index
    %0 = vector.load %arg2[%c0, %c0_0, %c0_1] : memref<1x128x64xbf16, #tpu.memory_space<vmem>>, vector<1x128x64xbf16>
    %1 = vector.shape_cast %0 : vector<1x128x64xbf16> to vector<128x64xbf16>
    %c0_2 = arith.constant 0 : index
    %c0_3 = arith.constant 0 : index
    %2 = vector.load %arg7[%c0_2, %c0_3] : memref<256x64xbf16, #tpu.memory_space<vmem>>, vector<128x64xbf16>
    tpu.vector_store %arg7[%c0_2, %c0_3], %1 {strides = array<i32>} : memref<256x64xbf16, #tpu.memory_space<vmem>>, vector<128x64xbf16>,
    %c0_4 = arith.constant 0 : index
    %c0_5 = arith.constant 0 : index
    %c0_6 = arith.constant 0 : index
    %3 = vector.load %arg3[%c0_4, %c0_5, %c0_6] : memref<1x128x64xbf16, #tpu.memory_space<vmem>>, vector<1x128x64xbf16>
    %4 = vector.shape_cast %3 : vector<1x128x64xbf16> to vector<128x64xbf16>
    %c128 = arith.constant 128 : index
    %c0_7 = arith.constant 0 : index
    %5 = vector.load %arg7[%c128, %c0_7] : memref<256x64xbf16, #tpu.memory_space<vmem>>, vector<128x64xbf16>
    tpu.vector_store %arg7[%c128, %c0_7], %4 {strides = array<i32>} : memref<256x64xbf16, #tpu.memory_space<vmem>>, vector<128x64xbf16>,
    %c0_8 = arith.constant 0 : index
    %c0_9 = arith.constant 0 : index
    %6 = vector.load %arg7[%c0_8, %c0_9] : memref<256x64xbf16, #tpu.memory_space<vmem>>, vector<128x64xbf16>
    %c0_10 = arith.constant 0 : index
    %c0_11 = arith.constant 0 : index
    %c0_12 = arith.constant 0 : index
    %7 = vector.load %arg4[%c0_10, %c0_11, %c0_12] : memref<4x64x128xbf16, #tpu.memory_space<vmem>>, vector<1x64x128xbf16>
    %8 = vector.shape_cast %7 : vector<1x64x128xbf16> to vector<64x128xbf16>
    %cst = arith.constant dense<0.000000e+00> : vector<128x128xf32>
    %9 = tpu.matmul %6, %8, %cst {dimension_numbers = #tpu.dot_dimension_numbers<[1], [0], [0], [1], [0, 0, 1, 1], [], []>} : vector<128x64xbf16>, vector<64x128xbf16>, vector<128x128xf32> -> vector<128x128xf32>
    %c1 = arith.constant 1 : index
    %c0_13 = arith.constant 0 : index
    %10 = vector.load %arg7[%c1, %c0_13] : memref<256x64xbf16, #tpu.memory_space<vmem>>, vector<128x64xbf16>
    %c1_14 = arith.constant 1 : index
    %c0_15 = arith.constant 0 : index
    %c0_16 = arith.constant 0 : index
    %11 = vector.load %arg4[%c1_14, %c0_15, %c0_16] : memref<4x64x128xbf16, #tpu.memory_space<vmem>>, vector<1x64x128xbf16>
    %12 = vector.shape_cast %11 : vector<1x64x128xbf16> to vector<64x128xbf16>
    %cst_17 = arith.constant dense<0.000000e+00> : vector<128x128xf32>
    %13 = tpu.matmul %10, %12, %cst_17 {dimension_numbers = #tpu.dot_dimension_numbers<[1], [0], [0], [1], [0, 0, 1, 1], [], []>} : vector<128x64xbf16>, vector<64x128xbf16>, vector<128x128xf32> -> vector<128x128xf32>
    %14 = arith.addf %9, %13 : vector<128x128xf32>
    %c2 = arith.constant 2 : index
    %c0_18 = arith.constant 0 : index
    %15 = vector.load %arg7[%c2, %c0_18] : memref<256x64xbf16, #tpu.memory_space<vmem>>, vector<128x64xbf16>
    %c2_19 = arith.constant 2 : index
    %c0_20 = arith.constant 0 : index
    %c0_21 = arith.constant 0 : index
    %16 = vector.load %arg4[%c2_19, %c0_20, %c0_21] : memref<4x64x128xbf16, #tpu.memory_space<vmem>>, vector<1x64x128xbf16>
    %17 = vector.shape_cast %16 : vector<1x64x128xbf16> to vector<64x128xbf16>
    %cst_22 = arith.constant dense<0.000000e+00> : vector<128x128xf32>
    %18 = tpu.matmul %15, %17, %cst_22 {dimension_numbers = #tpu.dot_dimension_numbers<[1], [0], [0], [1], [0, 0, 1, 1], [], []>} : vector<128x64xbf16>, vector<64x128xbf16>, vector<128x128xf32> -> vector<128x128xf32>
    %19 = arith.addf %14, %18 : vector<128x128xf32>
    %c3 = arith.constant 3 : index
    %c0_23 = arith.constant 0 : index
    %20 = vector.load %arg7[%c3, %c0_23] : memref<256x64xbf16, #tpu.memory_space<vmem>>, vector<128x64xbf16>
    %c3_24 = arith.constant 3 : index
    %c0_25 = arith.constant 0 : index
    %c0_26 = arith.constant 0 : index
    %21 = vector.load %arg4[%c3_24, %c0_25, %c0_26] : memref<4x64x128xbf16, #tpu.memory_space<vmem>>, vector<1x64x128xbf16>
    %22 = vector.shape_cast %21 : vector<1x64x128xbf16> to vector<64x128xbf16>
    %cst_27 = arith.constant dense<0.000000e+00> : vector<128x128xf32>
    %23 = tpu.matmul %20, %22, %cst_27 {dimension_numbers = #tpu.dot_dimension_numbers<[1], [0], [0], [1], [0, 0, 1, 1], [], []>} : vector<128x64xbf16>, vector<64x128xbf16>, vector<128x128xf32> -> vector<128x128xf32>
    %24 = arith.addf %19, %23 : vector<128x128xf32>
    %c0_28 = arith.constant 0 : index
    %c0_29 = arith.constant 0 : index
    %25 = vector.load %arg5[%c0_28, %c0_29] : memref<1x128xf32, #tpu.memory_space<vmem>>, vector<1x128xf32>
    %26 = vector.broadcast %25 : vector<1x128xf32> to vector<128x128xf32>
    %27 = arith.addf %24, %26 : vector<128x128xf32>
    %28 = arith.truncf %27 : vector<128x128xf32> to vector<128x128xbf16>
    %c0_30 = arith.constant 0 : index
    %c0_31 = arith.constant 0 : index
    %c0_32 = arith.constant 0 : index
    %29 = vector.load %arg6[%c0_30, %c0_31, %c0_32] : memref<1x128x128xbf16, #tpu.memory_space<vmem>>, vector<1x128x128xbf16>
    %30 = vector.shape_cast %29 : vector<1x128x128xbf16> to vector<128x128xbf16>
    %31 = vector.shape_cast %28 : vector<128x128xbf16> to vector<1x128x128xbf16>
    tpu.vector_store %arg6[%c0_30, %c0_31, %c0_32], %31 {strides = array<i32>} : memref<1x128x128xbf16, #tpu.memory_space<vmem>>, vector<1x128x128xbf16>,
    return
  }
  func.func @transform_0(%arg0: i32, %arg1: i32) -> (i32, i32, i32) {
    %c0_i32 = arith.constant 0 : i32
    %c0_i32_0 = arith.constant 0 : i32
    return %arg0, %arg1, %c0_i32 : i32, i32, i32
  }
  func.func @transform_1(%arg0: i32, %arg1: i32) -> (i32, i32, i32) {
    %c1_i32 = arith.constant 1 : i32
    %0 = arith.addi %arg1, %c1_i32 : i32
    %c1_i32_0 = arith.constant 1 : i32
    %1 = arith.muli %0, %c1_i32_0 : i32
    %c0_i32 = arith.constant 0 : i32
    %c0_i32_1 = arith.constant 0 : i32
    return %arg0, %1, %c0_i32 : i32, i32, i32
  }
  func.func @transform_2(%arg0: i32, %arg1: i32) -> (i32, i32, i32) {
    %c0_i32 = arith.constant 0 : i32
    %c0_i32_0 = arith.constant 0 : i32
    %c0_i32_1 = arith.constant 0 : i32
    %c0_i32_2 = arith.constant 0 : i32
    return %c0_i32, %c0_i32_0, %c0_i32_1 : i32, i32, i32
  }
  func.func @transform_3(%arg0: i32, %arg1: i32) -> (i32, i32) {
    %c0_i32 = arith.constant 0 : i32
    %c0_i32_0 = arith.constant 0 : i32
    %c0_i32_1 = arith.constant 0 : i32
    return %c0_i32, %c0_i32_0 : i32, i32
  }
  func.func @transform_4(%arg0: i32, %arg1: i32) -> (i32, i32, i32) {
    %c0_i32 = arith.constant 0 : i32
    %c0_i32_0 = arith.constant 0 : i32
    return %arg0, %arg1, %c0_i32 : i32, i32, i32
  }
}

</mosaic_0001>

<bundles_post_ra>
// kernel: _lambda_.4
= control target key start
LH: loop header
LB: loop body
LE: loop exit
PB: predicated region body
PF: predicated region fallthrough
CT: control target
= control target key end

     0   :  { %s1752_s15 = smov 0   ;;  %s1754_s16 = smov 0   ;;  %s1960_s0 = inlined_call_operand.vmem [shape: bf16[2,256,16], index: 0, kind: input, shape index: {}, may-alias: {0,1}]   ;;  %s1961_s1 = inlined_call_operand.vmem [shape: bf16[2,256,16], index: 1, kind: input, shape index: {}, may-alias: {0,1}]   ;;  %s1962_s2 = inlined_call_operand.vmem [shape: bf16[4,16,128], index: 2, kind: input, shape index: {}]   ;;  %s1963_s3 = inlined_call_operand.vmem [shape: f32[1,128], index: 3, kind: input, shape index: {}]   ;;  %s1964_s4 = inlined_call_operand.vmem [shape: bf16[2,128,128], index: 4, kind: output, shape index: {}]  }
   0x1   :  { %s1756_s17 = smov 0  }
   0x2 LB: > { %s26_s18 = sadd.s32 1, %s1721_s16  ;;  %p1351_p0 = scmp.ge.s32.totalorder %s1725_s17, 1  ;;  %s1725_s17 = sphi %s1756_s17, %s14_s17   ;;  %s1721_s16 = sphi %s1754_s16, %s1966_s16   ;;  %s1717_s15 = sphi %s1752_s15, %s1965_s15  }
   0x3   : > { %p28_p1 = scmp.ge.s32.totalorder %s26_s18, 2  ;;  %p204_p2 = scmp.lt.s32.totalorder %s1725_s17, 3 }
   0x5   : > { %s1968_s18 = smov (%p28_p1, %s26_s18), 0  ;;  %p205_p3 = pnand %p1351_p0, %p204_p2 }
   0x6   : > { %v1683_v0 = vld [vmem:[%s1962_s2 + $0x8] sm:$0xff] (!%p205_p3)   ;;  %p249_p4 = scmp.lt.s32.totalorder (!%p205_p3), %s1717_s15, 1  ;;  %v1684_v1 = vld [vmem:[%s1962_s2 + $0x10] sm:$0xff] (!%p205_p3)   ;;  %v1781_v2 = vld [vmem:[%s1962_s2] sm:$0xff] (!%p205_p3)   ;;  %vm345_vm0 = vcmask (!%p205_p3), 130048   ;;  %vm962_vm3 = vcmask (!%p205_p3), 1042432  }
   0x7   : > { %208 = sbr.rel (%p205_p3) target bundleno = 316 (0x13c), region = 36  ;;  %1539 = vmatprep.subr.bf16.mxu1 (!%p205_p3), %v1683_v0  ;;  %1575 = vmatprep.subr.bf16.mxu0 (!%p205_p3), %v1684_v1  ;;  %v1788_v3 = vld [vmem:[%s1962_s2 + $0x18] sm:$0xff] (!%p205_p3)   ;;  %vm440_vm1 = vsmask.f32 (!%p205_p3), 7424  ;;  %vm760_vm2 = vsmask.f32 (!%p205_p3), 3328 }
   0x8   : > { %1540 = vmatpush3.bf16.msra.mxu1 (!%p205_p3), %v1683_v0  ;;  %1576 = vmatpush3.bf16.msra.mxu0 (!%p205_p3), %v1684_v1 }
   0x9   : > { %1557 = vmatprep.subr.bf16.mxu1 (!%p205_p3), %v1781_v2  ;;  %1593 = vmatprep.subr.bf16.mxu0 (!%p205_p3), %v1788_v3 }
   0xe   : > { %s1970_s15 = smov (!%p249_p4, %s1717_s15), 1 }
   0xf   : > { %s1435_s25 = sshll.u32 %s1970_s15, 7  ;;  %s1438_s11 = sshll.u32 %s1970_s15, 6 }
  0x10   : > { %s256_s30 = scalar_lea.vmem %s1960_s0, %s1435_s25  ;;  %s1437_s5 = sadd.s32 64, %s1435_s25 }
  0x11   : > { %v1685_v4 = vld [vmem:[%s256_s30] sm:$0xff]   ;;  %v1686_v5 = vld [vmem:[%s256_s30 + $0x8] sm:$0xff]   ;;  %v1689_v6 = vld [vmem:[%s256_s30 + $0x10] sm:$0xff]   ;;  %s267_s8 = scalar_lea.vmem %s1961_s1, %s1437_s5  ;;  %s1929_s14 = scalar_lea.vmem %s1964_s4, %s1438_s11 }
  0x12   : > { %346 = vst.msk [vmem:[#allocation2] sm:$0xff] %vm345_vm0, %v1685_v4  ;;  %347 = vst.msk [vmem:[#allocation2 + $0x8] sm:$0xff] %vm345_vm0, %v1686_v5  ;;  %v1690_v7 = vld [vmem:[%s256_s30 + $0x18] sm:$0xff]   ;;  %v1691_v8 = vld [vmem:[%s256_s30 + $0x20] sm:$0xff]  }
  0x13   : > { %348 = vst.msk [vmem:[#allocation2 + $0x10] sm:$0xff] %vm345_vm0, %v1689_v6  ;;  %349 = vst.msk [vmem:[#allocation2 + $0x18] sm:$0xff] %vm345_vm0, %v1690_v7  ;;  %v1692_v9 = vld [vmem:[%s256_s30 + $0x28] sm:$0xff]   ;;  %v1693_v10 = vld [vmem:[%s256_s30 + $0x30] sm:$0xff]  }
  0x14   : > { %350 = vst.msk [vmem:[#allocation2 + $0x20] sm:$0xff] %vm345_vm0, %v1691_v8  ;;  %351 = vst.msk [vmem:[#allocation2 + $0x28] sm:$0xff] %vm345_vm0, %v1692_v9  ;;  %v1694_v11 = vld [vmem:[%s256_s30 + $0x38] sm:$0xff]   ;;  %v1695_v20 = vld [vmem:[%s267_s8] sm:$0xff]  }
  0x15   : > { %352 = vst.msk [vmem:[#allocation2 + $0x30] sm:$0xff] %vm345_vm0, %v1693_v10  ;;  %353 = vst.msk [vmem:[#allocation2 + $0x38] sm:$0xff] %vm345_vm0, %v1694_v11 }
  0x16   : > { %418 = vst.msk [vmem:[#allocation2 + $0x40] sm:$0xff] %vm345_vm0, %v1695_v20 }
  0x19   : > { %v1805_v12 = vld [vmem:[#allocation2] sm:$0xff]  ;;  %v1807_v13 = vld [vmem:[#allocation2 + $0x8] sm:$0xff] }
  0x1a   : > { %v755_v14 = vld [vmem:[#allocation2] sm:$0xf0]  ;;  %v442_v15 = vshrl.u32 %v1805_v12, 16  ;;  %v444_v16 = vshll.u32 %v1805_v12, 16  ;;  %v449_v17 = vshll.u32 %v1807_v13, 16  ;;  %v453_v18 = vshrl.u32 %v1807_v13, 16 }
  0x1b   : > { %v1813_v19 = vld [vmem:[#allocation2 + $0x10] sm:$0xff]  ;;  %v762_v21 = vshrl.u32 %v755_v14, 16  ;;  %v765_v22 = vshll.u32 %v755_v14, 16  ;;  %v1817_v29 = vld [vmem:[#allocation2 + $0x18] sm:$0xff]  ;;  %v1820_v34 = vld [vmem:[#allocation2 + $0x20] sm:$0xff] }
  0x1c   : > { %v457_v23 = vshll.u32 %v1813_v19, 16  ;;  %v461_v24 = vshrl.u32 %v1813_v19, 16  ;;  %v446_v25 = vrot.slane %v444_v16, 1  ;;  %v451_v26 = vrot.slane %v449_v17, 1  ;;  %v1822_v39 = vld [vmem:[#allocation2 + $0x28] sm:$0xff]  ;;  %v1826_v44 = vld [vmem:[#allocation2 + $0x30] sm:$0xff] }
  0x1d   : > { %v769_v27 = vrot.slane %v453_v18, 4  ;;  %v770_v28 = vrot.slane %v449_v17, 5  ;;  %v764_v30 = vrot.slane %v762_v21, 4  ;;  %v767_v31 = vrot.slane %v765_v22, 5  ;;  %v1845_v1 = vld [vmem:[#allocation2 + $0x38] sm:$0xff] }
  0x1e   : > { %v459_v32 = vrot.slane %v457_v23, 1  ;;  %v773_v33 = vrot.slane %v461_v24, 4  ;;  %v447_v35 = vor.u32 %v446_v25, %v442_v15  ;;  %v455_v36 = vor.u32 %v453_v18, %v451_v26  ;;  %v1855_v21 = vld [vmem:[#allocation2 + $0x40] sm:$0x1f] }
  0x1f   : > { %v771_v37 = vor.u32 %v770_v28, %v769_v27  ;;  %v774_v38 = vrot.slane %v457_v23, 5  ;;  %v768_v40 = vor.u32 %v767_v31, %v764_v30  ;;  %v465_v42 = vshll.u32 %v1817_v29, 16  ;;  %v436_v28 = vld [vmem:[#allocation2 + $0x40] sm:$0x1] }
  0x20   : > { %v463_v41 = vor.u32 %v461_v24, %v459_v32  ;;  %v469_v43 = vshrl.u32 %v1817_v29, 16  ;;  %v452_v45 = vsel %vm440_vm1, %v447_v35, %v451_v26  ;;  %v460_v46 = vsel %vm440_vm1, %v455_v36, %v459_v32 }
  0x21   : > { %v775_v47 = vor.u32 %v774_v38, %v773_v33  ;;  %v473_v48 = vshll.u32 %v1820_v34, 16  ;;  %1541 = vmatprep.mubr.msk.bf16.mxu1 %vm345_vm0, %v452_v45  ;;  %v772_v49 = vsel %vm760_vm2, %v768_v40, %v771_v37  ;;  %v467_v50 = vrot.slane %v465_v42, 1 }
  0x22   : > { %v777_v51 = vrot.slane %v469_v43, 4  ;;  %v778_v52 = vrot.slane %v465_v42, 5  ;;  %1577 = vmatprep.mubr.msk.bf16.mxu0 %vm345_vm0, %v772_v49  ;;  %1542 = vmatmul.mubr.msk.bf16.vlgmr.msra.gmra.mrb[0].mxu1 %vm345_vm0, %v460_v46  ;;  %v477_v55 = vshrl.u32 %v1820_v34, 16  ;;  %v481_v60 = vshll.u32 %v1822_v39, 16  ;;  %v949_v42 = vld [vmem:[#allocation2] sm:$0xe0] }
  0x23   : > { %v776_v53 = vsel %vm760_vm2, %v771_v37, %v775_v47  ;;  %v475_v54 = vrot.slane %v473_v48, 1  ;;  %v782_v56 = vrot.slane %v473_v48, 5  ;;  %1558 = vmatpush3.bf16.msra.mxu1 %v1781_v2  ;;  %v468_v57 = vsel %vm440_vm1, %v463_v41, %v467_v50 }
  0x24   : > { %1578 = vmatmul.mubr.msk.bf16.vlgmr.msra.gmra.mrb[0].mxu0 %vm345_vm0, %v776_v53  ;;  %v779_v58 = vor.u32 %v778_v52, %v777_v51  ;;  %v471_v59 = vor.u32 %v469_v43, %v467_v50  ;;  %1545 = vmatprep.mubr.msk.bf16.mxu1 %vm345_vm0, %v468_v57  ;;  %v781_v61 = vrot.slane %v477_v55, 4  ;;  %v485_v63 = vshrl.u32 %v1822_v39, 16 }
  0x25   : > { %1594 = vmatpush3.bf16.msra.mxu0 %v1788_v3  ;;  %v479_v62 = vor.u32 %v477_v55, %v475_v54  ;;  %v489_v0 = vshll.u32 %v1826_v44, 16  ;;  %v483_v4 = vrot.slane %v481_v60, 1  ;;  %v786_v5 = vrot.slane %v481_v60, 5 }
  0x26   : > { %v780_v2 = vsel %vm760_vm2, %v775_v47, %v779_v58  ;;  %v783_v6 = vor.u32 %v782_v56, %v781_v61  ;;  %v785_v7 = vrot.slane %v485_v63, 4  ;;  %v493_v3 = vshrl.u32 %v1826_v44, 16 }
  0x27   : > { %1581 = vmatprep.mubr.msk.bf16.mxu0 %vm345_vm0, %v780_v2  ;;  %v476_v8 = vsel %vm440_vm1, %v471_v59, %v475_v54  ;;  %v484_v9 = vsel %vm440_vm1, %v479_v62, %v483_v4  ;;  %v497_v10 = vshll.u32 %v1845_v1, 16  ;;  %v790_v16 = vrot.slane %v489_v0, 5 }
  0x28   : > { %v784_v11 = vsel %vm760_vm2, %v779_v58, %v783_v6  ;;  %v787_v14 = vor.u32 %v786_v5, %v785_v7  ;;  %v789_v15 = vrot.slane %v493_v3, 4  ;;  %v491_v17 = vrot.slane %v489_v0, 1 }
  0x29   : > { %v501_v18 = vshrl.u32 %v1845_v1, 16  ;;  %v794_v20 = vrot.slane %v497_v10, 5  ;;  %v487_v23 = vor.u32 %v485_v63, %v483_v4  ;;  %v499_v27 = vrot.slane %v497_v10, 1 }
  0x2a   : > { %1546 = vmatmul.mubr.msk.bf16.gmra.mrb[4].mxu1 %vm345_vm0, %v476_v8  ;;  %v788_v22 = vsel %vm760_vm2, %v783_v6, %v787_v14  ;;  %v495_v24 = vor.u32 %v493_v3, %v491_v17  ;;  %v791_v26 = vor.u32 %v790_v16, %v789_v15  ;;  %v798_v30 = vshrl.u32 %v1855_v21, 16 }
  0x2b   : > { %1549 = vmatprep.mubr.msk.bf16.mxu1 %vm345_vm0, %v484_v9  ;;  %v793_v25 = vrot.slane %v501_v18, 4  ;;  %v801_v31 = vshll.u32 %v1855_v21, 16  ;;  %v492_v33 = vsel %vm440_vm1, %v487_v23, %v491_v17  ;;  %v505_v35 = vshll.u32 %v436_v28, 16 }
  0x2c   : > { %1582 = vmatmul.mubr.msk.bf16.gmra.mrb[4].mxu0 %vm345_vm0, %v784_v11  ;;  %v792_v36 = vsel %vm760_vm2, %v787_v14, %v791_v26  ;;  %v500_v37 = vsel %vm440_vm1, %v495_v24, %v499_v27  ;;  %v800_v38 = vrot.slane %v798_v30, 4  ;;  %v503_v43 = vor.u32 %v501_v18, %v499_v27 }
  0x2d   : > { %1585 = vmatprep.mubr.msk.bf16.mxu0 %vm345_vm0, %v788_v22  ;;  %v795_v32 = vor.u32 %v794_v20, %v793_v25  ;;  %v803_v40 = vrot.slane %v801_v31, 5  ;;  %v507_v45 = vrot.slane %v505_v35, 1  ;;  %v963_v47 = vrot.slane %v949_v42, 5 }
  0x2e   : > { %v964_v48 = vrot.slane %v1807_v13, 5  ;;  %v966_v52 = vrot.slane %v1813_v19, 5  ;;  %v968_v53 = vrot.slane %v1817_v29, 5  ;;  %v972_v56 = vrot.slane %v1822_v39, 5 }
  0x2f   : > { %v796_v41 = vsel %vm760_vm2, %v791_v26, %v795_v32  ;;  %v804_v46 = vor.u32 %v803_v40, %v800_v38  ;;  %v508_v49 = vsel %vm440_vm1, %v503_v43, %v507_v45 }
  0x30   : > { %v965_v51 = vsel %vm962_vm3, %v963_v47, %v964_v48  ;;  %v967_v54 = vsel %vm962_vm3, %v964_v48, %v966_v52  ;;  %v969_v55 = vsel %vm962_vm3, %v966_v52, %v968_v53 }
  0x31   : > { %v805_v50 = vsel %vm760_vm2, %v795_v32, %v804_v46 }
  0x32   : > { %1550 = vmatmul.mubr.msk.bf16.gmra.mrb[8].mxu1 %vm345_vm0, %v492_v33 }
  0x33   : > { %1553 = vmatprep.mubr.msk.bf16.mxu1 %vm345_vm0, %v500_v37 }
  0x34   : > { %1586 = vmatmul.mubr.msk.bf16.gmra.mrb[8].mxu0 %vm345_vm0, %v792_v36 }
  0x35   : > { %1589 = vmatprep.mubr.msk.bf16.mxu0 %vm345_vm0, %v796_v41 }
  0x3a   : > { %1554 = vmatmul.mubr.msk.bf16.gmra.mrb[12].mxu1 %vm345_vm0, %v508_v49 }
  0x3b   : > { %1559 = vmatprep.mubr.msk.bf16.mxu1 %vm345_vm0, %v1805_v12  ;;  %v970_v12 = vrot.slane %v1820_v34, 5 }
  0x3c   : > { %1590 = vmatmul.mubr.msk.bf16.gmra.mrb[12].mxu0 %vm345_vm0, %v805_v50 }
  0x3d   : > { %1595 = vmatprep.mubr.msk.bf16.mxu0 %vm345_vm0, %v965_v51  ;;  %v971_v57 = vsel %vm962_vm3, %v968_v53, %v970_v12  ;;  %v973_v58 = vsel %vm962_vm3, %v970_v12, %v972_v56 }
  0x42   : > { %1560 = vmatmul.mubr.msk.bf16.vlgmr.msra.gmra.mrb[0].mxu1 %vm345_vm0, %v1807_v13  ;;  %v974_v13 = vrot.slane %v1826_v44, 5 }
  0x43   : > { %1563 = vmatprep.mubr.msk.bf16.mxu1 %vm345_vm0, %v1813_v19  ;;  %v976_v19 = vrot.slane %v1845_v1, 5 }
  0x44   : > { %1596 = vmatmul.mubr.msk.bf16.vlgmr.msra.gmra.mrb[0].mxu0 %vm345_vm0, %v967_v54  ;;  %v975_v59 = vsel %vm962_vm3, %v972_v56, %v974_v13 }
  0x45   : > { %1599 = vmatprep.mubr.msk.bf16.mxu0 %vm345_vm0, %v969_v55  ;;  %v977_v60 = vsel %vm962_vm3, %v974_v13, %v976_v19 }
  0x4a   : > { %1564 = vmatmul.mubr.msk.bf16.gmra.mrb[4].mxu1 %vm345_vm0, %v1817_v29  ;;  %v978_v29 = vrot.slane %v1855_v21, 5 }
  0x4b   : > { %1567 = vmatprep.mubr.msk.bf16.mxu1 %vm345_vm0, %v1820_v34 }
  0x4c   : > { %1600 = vmatmul.mubr.msk.bf16.gmra.mrb[4].mxu0 %vm345_vm0, %v971_v57  ;;  %v979_v34 = vsel %vm962_vm3, %v976_v19, %v978_v29 }
  0x4d   : > { %1603 = vmatprep.mubr.msk.bf16.mxu0 %vm345_vm0, %v973_v58 }
  0x52   : > { %1568 = vmatmul.mubr.msk.bf16.gmra.mrb[8].mxu1 %vm345_vm0, %v1822_v39  ;;  %v1919_v39 = vld [vmem:[%s1963_s3] ss:$0 sm:$0xff] }
  0x53   : > { %1571 = vmatprep.mubr.msk.bf16.mxu1 %vm345_vm0, %v1826_v44 }
  0x54   : > { %1604 = vmatmul.mubr.msk.bf16.gmra.mrb[8].mxu0 %vm345_vm0, %v975_v59 }
  0x55   : > { %1607 = vmatprep.mubr.msk.bf16.mxu0 %vm345_vm0, %v977_v60 }
  0x5a   : > { %1572 = vmatmul.mubr.msk.bf16.gmra.mrb[12].mxu1 %vm345_vm0, %v1845_v1 }
  0x5c   : > { %1608 = vmatmul.mubr.msk.bf16.gmra.mrb[12].mxu0 %vm345_vm0, %v979_v34 }
 0x115   : > { %v1561_v61 = vpop.f32.mrb[0].mxu1 }
 0x116   : > { %v692_v44 = vpop.f32.mrb[1].mxu1 }
 0x117   : > { %v1597_v62 = vpop.f32.mrb[0].mxu0  ;;  %v1562_v2 = vpop.f32.mrb[2].mxu1 }
 0x118   : > { %v1611_v63 = vadd.f32 %v1597_v62, %v1561_v61  ;;  %v1044_v0 = vpop.f32.mrb[1].mxu0  ;;  %v695_v6 = vpop.f32.mrb[3].mxu1 }
 0x119   : > { %v1612_v4 = vadd.f32 %v1044_v0, %v692_v44  ;;  %v1598_v5 = vpop.f32.mrb[2].mxu0 }
 0x11a   : > { %v1132_v7 = vadd.f32 %v1611_v63, %v1919_v39  ;;  %v1613_v1 = vadd.f32 %v1598_v5, %v1562_v2  ;;  %v1047_v3 = vpop.f32.mrb[3].mxu0 }
 0x11b   : > { %v1130_v8 = vadd.f32 %v1612_v4, %v1919_v39  ;;  %v1614_v9 = vadd.f32 %v1047_v3, %v695_v6 }
 0x11c   : > { %v1133_v10 = vadd.f32 %v1613_v1, %v1919_v39  ;;  %v1148_v14 = vmax.f32 %v1132_v7, 0.0 }
 0x11d   : > { %v1131_v11 = vadd.f32 %v1614_v9, %v1919_v39  ;;  %v1565_v16 = vpop.f32.mrb[4].mxu1  ;;  %v1146_v17 = vmax.f32 %v1130_v8, 0.0 }
 0x11e   : > { %v1149_v15 = vmax.f32 %v1133_v10, 0.0  ;;  %v708_v21 = vpop.f32.mrb[5].mxu1 }
 0x11f   : > { %v1147_v18 = vmax.f32 %v1131_v11, 0.0  ;;  %v1601_v20 = vpop.f32.mrb[4].mxu0  ;;  %v1566_v25 = vpop.f32.mrb[6].mxu1 }
 0x120   : > { %v1463_v22 = vpack.c.bf16 %v1149_v15, %v1148_v14  ;;  %v1615_v23 = vadd.f32 %v1601_v20, %v1565_v16  ;;  %v1060_v24 = vpop.f32.mrb[5].mxu0  ;;  %v711_v30 = vpop.f32.mrb[7].mxu1 }
 0x121   : > { %v1458_v26 = vpack.c.bf16 %v1147_v18, %v1146_v17  ;;  %v1616_v27 = vadd.f32 %v1060_v24, %v708_v21  ;;  %v1602_v28 = vpop.f32.mrb[6].mxu0 }
 0x122   : > { %1496 = vst [vmem:[%s1929_s14 + $0x8] sm:$0xff] %v1463_v22   ;;  %v1136_v31 = vadd.f32 %v1615_v23, %v1919_v39  ;;  %v1617_v32 = vadd.f32 %v1602_v28, %v1566_v25  ;;  %v1063_v33 = vpop.f32.mrb[7].mxu0 }
 0x123   : > { %1459 = vst [vmem:[%s1929_s14] sm:$0xff] %v1458_v26   ;;  %v1134_v35 = vadd.f32 %v1616_v27, %v1919_v39  ;;  %v1618_v36 = vadd.f32 %v1063_v33, %v711_v30 }
 0x124   : > { %v1137_v37 = vadd.f32 %v1617_v32, %v1919_v39  ;;  %v1152_v40 = vmax.f32 %v1136_v31, 0.0 }
 0x125   : > { %v1135_v38 = vadd.f32 %v1618_v36, %v1919_v39  ;;  %v1569_v42 = vpop.f32.mrb[8].mxu1  ;;  %v1150_v43 = vmax.f32 %v1134_v35, 0.0 }
 0x126   : > { %v1153_v41 = vmax.f32 %v1137_v37, 0.0  ;;  %v724_v47 = vpop.f32.mrb[9].mxu1 }
 0x127   : > { %v1151_v45 = vmax.f32 %v1135_v38, 0.0  ;;  %v1605_v46 = vpop.f32.mrb[8].mxu0  ;;  %v1570_v51 = vpop.f32.mrb[10].mxu1 }
 0x128   : > { %v1473_v48 = vpack.c.bf16 %v1153_v41, %v1152_v40  ;;  %v1619_v49 = vadd.f32 %v1605_v46, %v1569_v42  ;;  %v1076_v50 = vpop.f32.mrb[9].mxu0  ;;  %v727_v55 = vpop.f32.mrb[11].mxu1 }
 0x129   : > { %v1468_v52 = vpack.c.bf16 %v1151_v45, %v1150_v43  ;;  %v1620_v53 = vadd.f32 %v1076_v50, %v724_v47  ;;  %v1606_v54 = vpop.f32.mrb[10].mxu0 }
 0x12a   : > { %1498 = vst [vmem:[%s1929_s14 + $0x18] sm:$0xff] %v1473_v48   ;;  %v1140_v12 = vadd.f32 %v1619_v49, %v1919_v39  ;;  %v1621_v56 = vadd.f32 %v1606_v54, %v1570_v51  ;;  %v1079_v57 = vpop.f32.mrb[11].mxu0 }
 0x12b   : > { %1497 = vst [vmem:[%s1929_s14 + $0x10] sm:$0xff] %v1468_v52   ;;  %v1138_v58 = vadd.f32 %v1620_v53, %v1919_v39  ;;  %v1622_v13 = vadd.f32 %v1079_v57, %v727_v55 }
 0x12c   : > { %v1141_v19 = vadd.f32 %v1621_v56, %v1919_v39  ;;  %v1156_v60 = vmax.f32 %v1140_v12, 0.0 }
 0x12d   : > { %v1139_v59 = vadd.f32 %v1622_v13, %v1919_v39  ;;  %v1573_v34 = vpop.f32.mrb[12].mxu1  ;;  %v1154_v61 = vmax.f32 %v1138_v58, 0.0 }
 0x12e   : > { %v1157_v29 = vmax.f32 %v1141_v19, 0.0  ;;  %v740_v63 = vpop.f32.mrb[13].mxu1 }
 0x12f   : > { %v1155_v62 = vmax.f32 %v1139_v59, 0.0  ;;  %v1609_v44 = vpop.f32.mrb[12].mxu0  ;;  %v1574_v5 = vpop.f32.mrb[14].mxu1 }
 0x130   : > { %v1483_v0 = vpack.c.bf16 %v1157_v29, %v1156_v60  ;;  %v1623_v2 = vadd.f32 %v1609_v44, %v1573_v34  ;;  %v1092_v4 = vpop.f32.mrb[13].mxu0  ;;  %v743_v3 = vpop.f32.mrb[15].mxu1 }
 0x131   : > { %v1478_v6 = vpack.c.bf16 %v1155_v62, %v1154_v61  ;;  %v1624_v7 = vadd.f32 %v1092_v4, %v740_v63  ;;  %v1610_v1 = vpop.f32.mrb[14].mxu0 }
 0x132   : > { %1500 = vst [vmem:[%s1929_s14 + $0x28] sm:$0xff] %v1483_v0   ;;  %v1144_v8 = vadd.f32 %v1623_v2, %v1919_v39  ;;  %v1625_v9 = vadd.f32 %v1610_v1, %v1574_v5  ;;  %v1095_v10 = vpop.f32.mrb[15].mxu0 }
 0x133   : > { %1499 = vst [vmem:[%s1929_s14 + $0x20] sm:$0xff] %v1478_v6   ;;  %v1142_v11 = vadd.f32 %v1624_v7, %v1919_v39  ;;  %v1626_v14 = vadd.f32 %v1095_v10, %v743_v3 }
 0x134   : > { %v1145_v15 = vadd.f32 %v1625_v9, %v1919_v39  ;;  %v1160_v17 = vmax.f32 %v1144_v8, 0.0 }
 0x135   : > { %v1143_v16 = vadd.f32 %v1626_v14, %v1919_v39  ;;  %v1158_v20 = vmax.f32 %v1142_v11, 0.0 }
 0x136   : > { %v1161_v18 = vmax.f32 %v1145_v15, 0.0 }
 0x137   : > { %v1159_v21 = vmax.f32 %v1143_v16, 0.0 }
 0x138   : > { %v1493_v22 = vpack.c.bf16 %v1161_v18, %v1160_v17 }
 0x139   : > { %v1488_v23 = vpack.c.bf16 %v1159_v21, %v1158_v20 }
 0x13a   : > { %1502 = vst [vmem:[%s1929_s14 + $0x38] sm:$0xff] %v1493_v22  }
 0x13b   : > { %1501 = vst [vmem:[%s1929_s14 + $0x30] sm:$0xff] %v1488_v23  }
 0x13c PF: > { %s14_s17 = sadd.s32 1, %s1725_s17   ;;  %s1965_s15 = smov %s1721_s16 }
 0x13d   : > { %p11_p5 = scmp.ge.s32.totalorder %s14_s17, 4   ;;  %s1966_s16 = smov %s1968_s18 }
 0x13f   :  { %13 = sbr.rel (!%p11_p5) target bundleno = 2 (0x2), region = 72 }

// kernel: _lambda_.5
= control target key start
LH: loop header
LB: loop body
LE: loop exit
PB: predicated region body
PF: predicated region fallthrough
CT: control target
= control target key end

     0   :  { %s1752_s15 = smov 0   ;;  %s1754_s16 = smov 0   ;;  %s1960_s0 = inlined_call_operand.vmem [shape: bf16[2,256,16], index: 0, kind: input, shape index: {}, may-alias: {0,1}]   ;;  %s1961_s1 = inlined_call_operand.vmem [shape: bf16[2,256,16], index: 1, kind: input, shape index: {}, may-alias: {0,1}]   ;;  %s1962_s2 = inlined_call_operand.vmem [shape: bf16[4,16,128], index: 2, kind: input, shape index: {}]   ;;  %s1963_s3 = inlined_call_operand.vmem [shape: f32[1,128], index: 3, kind: input, shape index: {}]   ;;  %s1964_s4 = inlined_call_operand.vmem [shape: bf16[2,128,128], index: 4, kind: output, shape index: {}]  }
   0x1   :  { %s1756_s17 = smov 0  }
   0x2 LB: > { %s26_s18 = sadd.s32 1, %s1721_s16  ;;  %p1351_p0 = scmp.ge.s32.totalorder %s1725_s17, 1  ;;  %s1725_s17 = sphi %s1756_s17, %s14_s17   ;;  %s1721_s16 = sphi %s1754_s16, %s1966_s16   ;;  %s1717_s15 = sphi %s1752_s15, %s1965_s15  }
   0x3   : > { %p28_p1 = scmp.ge.s32.totalorder %s26_s18, 2  ;;  %p204_p2 = scmp.lt.s32.totalorder %s1725_s17, 3 }
   0x5   : > { %s1968_s18 = smov (%p28_p1, %s26_s18), 0  ;;  %p205_p3 = pnand %p1351_p0, %p204_p2 }
   0x6   : > { %v1683_v0 = vld [vmem:[%s1962_s2 + $0x8] sm:$0xff] (!%p205_p3)   ;;  %p249_p4 = scmp.lt.s32.totalorder (!%p205_p3), %s1717_s15, 1  ;;  %v1684_v1 = vld [vmem:[%s1962_s2 + $0x10] sm:$0xff] (!%p205_p3)   ;;  %v1781_v2 = vld [vmem:[%s1962_s2] sm:$0xff] (!%p205_p3)   ;;  %vm345_vm0 = vcmask (!%p205_p3), 130048   ;;  %vm962_vm3 = vcmask (!%p205_p3), 1044480  }
   0x7   : > { %208 = sbr.rel (%p205_p3) target bundleno = 316 (0x13c), region = 36  ;;  %1539 = vmatprep.subr.bf16.mxu1 (!%p205_p3), %v1683_v0  ;;  %1575 = vmatprep.subr.bf16.mxu0 (!%p205_p3), %v1684_v1  ;;  %v1788_v3 = vld [vmem:[%s1962_s2 + $0x18] sm:$0xff] (!%p205_p3)   ;;  %vm440_vm1 = vsmask.f32 (!%p205_p3), 7424  ;;  %vm760_vm2 = vsmask.f32 (!%p205_p3), 5376 }
   0x8   : > { %1540 = vmatpush3.bf16.msra.mxu1 (!%p205_p3), %v1683_v0  ;;  %1576 = vmatpush3.bf16.msra.mxu0 (!%p205_p3), %v1684_v1 }
   0x9   : > { %1557 = vmatprep.subr.bf16.mxu1 (!%p205_p3), %v1781_v2  ;;  %1593 = vmatprep.subr.bf16.mxu0 (!%p205_p3), %v1788_v3 }
   0xe   : > { %s1970_s15 = smov (!%p249_p4, %s1717_s15), 1 }
   0xf   : > { %s1435_s25 = sshll.u32 %s1970_s15, 7  ;;  %s1438_s11 = sshll.u32 %s1970_s15, 6 }
  0x10   : > { %s256_s30 = scalar_lea.vmem %s1960_s0, %s1435_s25  ;;  %s1437_s5 = sadd.s32 64, %s1435_s25 }
  0x11   : > { %v1685_v4 = vld [vmem:[%s256_s30] sm:$0xff]   ;;  %v1686_v5 = vld [vmem:[%s256_s30 + $0x8] sm:$0xff]   ;;  %v1689_v6 = vld [vmem:[%s256_s30 + $0x10] sm:$0xff]   ;;  %s267_s8 = scalar_lea.vmem %s1961_s1, %s1437_s5  ;;  %s1929_s14 = scalar_lea.vmem %s1964_s4, %s1438_s11 }
  0x12   : > { %346 = vst.msk [vmem:[#allocation2] sm:$0xff] %vm345_vm0, %v1685_v4  ;;  %347 = vst.msk [vmem:[#allocation2 + $0x8] sm:$0xff] %vm345_vm0, %v1686_v5  ;;  %v1690_v7 = vld [vmem:[%s256_s30 + $0x18] sm:$0xff]   ;;  %v1691_v8 = vld [vmem:[%s256_s30 + $0x20] sm:$0xff]  }
  0x13   : > { %348 = vst.msk [vmem:[#allocation2 + $0x10] sm:$0xff] %vm345_vm0, %v1689_v6  ;;  %349 = vst.msk [vmem:[#allocation2 + $0x18] sm:$0xff] %vm345_vm0, %v1690_v7  ;;  %v1692_v9 = vld [vmem:[%s256_s30 + $0x28] sm:$0xff]   ;;  %v1693_v10 = vld [vmem:[%s256_s30 + $0x30] sm:$0xff]  }
  0x14   : > { %350 = vst.msk [vmem:[#allocation2 + $0x20] sm:$0xff] %vm345_vm0, %v1691_v8  ;;  %351 = vst.msk [vmem:[#allocation2 + $0x28] sm:$0xff] %vm345_vm0, %v1692_v9  ;;  %v1694_v11 = vld [vmem:[%s256_s30 + $0x38] sm:$0xff]   ;;  %v1695_v20 = vld [vmem:[%s267_s8] sm:$0xff]  }
  0x15   : > { %352 = vst.msk [vmem:[#allocation2 + $0x30] sm:$0xff] %vm345_vm0, %v1693_v10  ;;  %353 = vst.msk [vmem:[#allocation2 + $0x38] sm:$0xff] %vm345_vm0, %v1694_v11 }
  0x16   : > { %418 = vst.msk [vmem:[#allocation2 + $0x40] sm:$0xff] %vm345_vm0, %v1695_v20 }
  0x19   : > { %v1805_v12 = vld [vmem:[#allocation2] sm:$0xff]  ;;  %v1807_v13 = vld [vmem:[#allocation2 + $0x8] sm:$0xff] }
  0x1a   : > { %v755_v14 = vld [vmem:[#allocation2] sm:$0xfc]  ;;  %v442_v15 = vshrl.u32 %v1805_v12, 16  ;;  %v444_v16 = vshll.u32 %v1805_v12, 16  ;;  %v449_v17 = vshll.u32 %v1807_v13, 16  ;;  %v453_v18 = vshrl.u32 %v1807_v13, 16 }
  0x1b   : > { %v1813_v19 = vld [vmem:[#allocation2 + $0x10] sm:$0xff]  ;;  %v762_v21 = vshrl.u32 %v755_v14, 16  ;;  %v765_v22 = vshll.u32 %v755_v14, 16  ;;  %v1817_v29 = vld [vmem:[#allocation2 + $0x18] sm:$0xff]  ;;  %v1820_v34 = vld [vmem:[#allocation2 + $0x20] sm:$0xff] }
  0x1c   : > { %v457_v23 = vshll.u32 %v1813_v19, 16  ;;  %v461_v24 = vshrl.u32 %v1813_v19, 16  ;;  %v446_v25 = vrot.slane %v444_v16, 1  ;;  %v451_v26 = vrot.slane %v449_v17, 1  ;;  %v1822_v39 = vld [vmem:[#allocation2 + $0x28] sm:$0xff]  ;;  %v1826_v44 = vld [vmem:[#allocation2 + $0x30] sm:$0xff] }
  0x1d   : > { %v769_v27 = vrot.slane %v453_v18, 2  ;;  %v770_v28 = vrot.slane %v449_v17, 3  ;;  %v764_v30 = vrot.slane %v762_v21, 2  ;;  %v767_v31 = vrot.slane %v765_v22, 3  ;;  %v1845_v1 = vld [vmem:[#allocation2 + $0x38] sm:$0xff] }
  0x1e   : > { %v459_v32 = vrot.slane %v457_v23, 1  ;;  %v773_v33 = vrot.slane %v461_v24, 2  ;;  %v447_v35 = vor.u32 %v446_v25, %v442_v15  ;;  %v455_v36 = vor.u32 %v453_v18, %v451_v26  ;;  %v1855_v21 = vld [vmem:[#allocation2 + $0x40] sm:$0x7] }
  0x1f   : > { %v771_v37 = vor.u32 %v770_v28, %v769_v27  ;;  %v774_v38 = vrot.slane %v457_v23, 3  ;;  %v768_v40 = vor.u32 %v767_v31, %v764_v30  ;;  %v465_v42 = vshll.u32 %v1817_v29, 16  ;;  %v436_v28 = vld [vmem:[#allocation2 + $0x40] sm:$0x1] }
  0x20   : > { %v463_v41 = vor.u32 %v461_v24, %v459_v32  ;;  %v469_v43 = vshrl.u32 %v1817_v29, 16  ;;  %v452_v45 = vsel %vm440_vm1, %v447_v35, %v451_v26  ;;  %v460_v46 = vsel %vm440_vm1, %v455_v36, %v459_v32 }
  0x21   : > { %v775_v47 = vor.u32 %v774_v38, %v773_v33  ;;  %v473_v48 = vshll.u32 %v1820_v34, 16  ;;  %1541 = vmatprep.mubr.msk.bf16.mxu1 %vm345_vm0, %v452_v45  ;;  %v772_v49 = vsel %vm760_vm2, %v768_v40, %v771_v37  ;;  %v467_v50 = vrot.slane %v465_v42, 1 }
  0x22   : > { %v777_v51 = vrot.slane %v469_v43, 2  ;;  %v778_v52 = vrot.slane %v465_v42, 3  ;;  %1577 = vmatprep.mubr.msk.bf16.mxu0 %vm345_vm0, %v772_v49  ;;  %1542 = vmatmul.mubr.msk.bf16.vlgmr.msra.gmra.mrb[0].mxu1 %vm345_vm0, %v460_v46  ;;  %v477_v55 = vshrl.u32 %v1820_v34, 16  ;;  %v481_v60 = vshll.u32 %v1822_v39, 16  ;;  %v949_v42 = vld [vmem:[#allocation2] sm:$0xf8] }
  0x23   : > { %v776_v53 = vsel %vm760_vm2, %v771_v37, %v775_v47  ;;  %v475_v54 = vrot.slane %v473_v48, 1  ;;  %v782_v56 = vrot.slane %v473_v48, 3  ;;  %1558 = vmatpush3.bf16.msra.mxu1 %v1781_v2  ;;  %v468_v57 = vsel %vm440_vm1, %v463_v41, %v467_v50 }
  0x24   : > { %1578 = vmatmul.mubr.msk.bf16.vlgmr.msra.gmra.mrb[0].mxu0 %vm345_vm0, %v776_v53  ;;  %v779_v58 = vor.u32 %v778_v52, %v777_v51  ;;  %v471_v59 = vor.u32 %v469_v43, %v467_v50  ;;  %1545 = vmatprep.mubr.msk.bf16.mxu1 %vm345_vm0, %v468_v57  ;;  %v781_v61 = vrot.slane %v477_v55, 2  ;;  %v485_v63 = vshrl.u32 %v1822_v39, 16 }
  0x25   : > { %1594 = vmatpush3.bf16.msra.mxu0 %v1788_v3  ;;  %v479_v62 = vor.u32 %v477_v55, %v475_v54  ;;  %v489_v0 = vshll.u32 %v1826_v44, 16  ;;  %v483_v4 = vrot.slane %v481_v60, 1  ;;  %v786_v5 = vrot.slane %v481_v60, 3 }
  0x26   : > { %v780_v2 = vsel %vm760_vm2, %v775_v47, %v779_v58  ;;  %v783_v6 = vor.u32 %v782_v56, %v781_v61  ;;  %v785_v7 = vrot.slane %v485_v63, 2  ;;  %v493_v3 = vshrl.u32 %v1826_v44, 16 }
  0x27   : > { %1581 = vmatprep.mubr.msk.bf16.mxu0 %vm345_vm0, %v780_v2  ;;  %v476_v8 = vsel %vm440_vm1, %v471_v59, %v475_v54  ;;  %v484_v9 = vsel %vm440_vm1, %v479_v62, %v483_v4  ;;  %v497_v10 = vshll.u32 %v1845_v1, 16  ;;  %v790_v16 = vrot.slane %v489_v0, 3 }
  0x28   : > { %v784_v11 = vsel %vm760_vm2, %v779_v58, %v783_v6  ;;  %v787_v14 = vor.u32 %v786_v5, %v785_v7  ;;  %v789_v15 = vrot.slane %v493_v3, 2  ;;  %v491_v17 = vrot.slane %v489_v0, 1 }
  0x29   : > { %v501_v18 = vshrl.u32 %v1845_v1, 16  ;;  %v794_v20 = vrot.slane %v497_v10, 3  ;;  %v487_v23 = vor.u32 %v485_v63, %v483_v4  ;;  %v499_v27 = vrot.slane %v497_v10, 1 }
  0x2a   : > { %1546 = vmatmul.mubr.msk.bf16.gmra.mrb[4].mxu1 %vm345_vm0, %v476_v8  ;;  %v788_v22 = vsel %vm760_vm2, %v783_v6, %v787_v14  ;;  %v495_v24 = vor.u32 %v493_v3, %v491_v17  ;;  %v791_v26 = vor.u32 %v790_v16, %v789_v15  ;;  %v798_v30 = vshrl.u32 %v1855_v21, 16 }
  0x2b   : > { %1549 = vmatprep.mubr.msk.bf16.mxu1 %vm345_vm0, %v484_v9  ;;  %v793_v25 = vrot.slane %v501_v18, 2  ;;  %v801_v31 = vshll.u32 %v1855_v21, 16  ;;  %v492_v33 = vsel %vm440_vm1, %v487_v23, %v491_v17  ;;  %v505_v35 = vshll.u32 %v436_v28, 16 }
  0x2c   : > { %1582 = vmatmul.mubr.msk.bf16.gmra.mrb[4].mxu0 %vm345_vm0, %v784_v11  ;;  %v792_v36 = vsel %vm760_vm2, %v787_v14, %v791_v26  ;;  %v500_v37 = vsel %vm440_vm1, %v495_v24, %v499_v27  ;;  %v800_v38 = vrot.slane %v798_v30, 2  ;;  %v503_v43 = vor.u32 %v501_v18, %v499_v27 }
  0x2d   : > { %1585 = vmatprep.mubr.msk.bf16.mxu0 %vm345_vm0, %v788_v22  ;;  %v795_v32 = vor.u32 %v794_v20, %v793_v25  ;;  %v803_v40 = vrot.slane %v801_v31, 3  ;;  %v507_v45 = vrot.slane %v505_v35, 1  ;;  %v963_v47 = vrot.slane %v949_v42, 3 }
  0x2e   : > { %v964_v48 = vrot.slane %v1807_v13, 3  ;;  %v966_v52 = vrot.slane %v1813_v19, 3  ;;  %v968_v53 = vrot.slane %v1817_v29, 3  ;;  %v972_v56 = vrot.slane %v1822_v39, 3 }
  0x2f   : > { %v796_v41 = vsel %vm760_vm2, %v791_v26, %v795_v32  ;;  %v804_v46 = vor.u32 %v803_v40, %v800_v38  ;;  %v508_v49 = vsel %vm440_vm1, %v503_v43, %v507_v45 }
  0x30   : > { %v965_v51 = vsel %vm962_vm3, %v963_v47, %v964_v48  ;;  %v967_v54 = vsel %vm962_vm3, %v964_v48, %v966_v52  ;;  %v969_v55 = vsel %vm962_vm3, %v966_v52, %v968_v53 }
  0x31   : > { %v805_v50 = vsel %vm760_vm2, %v795_v32, %v804_v46 }
  0x32   : > { %1550 = vmatmul.mubr.msk.bf16.gmra.mrb[8].mxu1 %vm345_vm0, %v492_v33 }
  0x33   : > { %1553 = vmatprep.mubr.msk.bf16.mxu1 %vm345_vm0, %v500_v37 }
  0x34   : > { %1586 = vmatmul.mubr.msk.bf16.gmra.mrb[8].mxu0 %vm345_vm0, %v792_v36 }
  0x35   : > { %1589 = vmatprep.mubr.msk.bf16.mxu0 %vm345_vm0, %v796_v41 }
  0x3a   : > { %1554 = vmatmul.mubr.msk.bf16.gmra.mrb[12].mxu1 %vm345_vm0, %v508_v49 }
  0x3b   : > { %1559 = vmatprep.mubr.msk.bf16.mxu1 %vm345_vm0, %v1805_v12  ;;  %v970_v12 = vrot.slane %v1820_v34, 3 }
  0x3c   : > { %1590 = vmatmul.mubr.msk.bf16.gmra.mrb[12].mxu0 %vm345_vm0, %v805_v50 }
  0x3d   : > { %1595 = vmatprep.mubr.msk.bf16.mxu0 %vm345_vm0, %v965_v51  ;;  %v971_v57 = vsel %vm962_vm3, %v968_v53, %v970_v12  ;;  %v973_v58 = vsel %vm962_vm3, %v970_v12, %v972_v56 }
  0x42   : > { %1560 = vmatmul.mubr.msk.bf16.vlgmr.msra.gmra.mrb[0].mxu1 %vm345_vm0, %v1807_v13  ;;  %v974_v13 = vrot.slane %v1826_v44, 3 }
  0x43   : > { %1563 = vmatprep.mubr.msk.bf16.mxu1 %vm345_vm0, %v1813_v19  ;;  %v976_v19 = vrot.slane %v1845_v1, 3 }
  0x44   : > { %1596 = vmatmul.mubr.msk.bf16.vlgmr.msra.gmra.mrb[0].mxu0 %vm345_vm0, %v967_v54  ;;  %v975_v59 = vsel %vm962_vm3, %v972_v56, %v974_v13 }
  0x45   : > { %1599 = vmatprep.mubr.msk.bf16.mxu0 %vm345_vm0, %v969_v55  ;;  %v977_v60 = vsel %vm962_vm3, %v974_v13, %v976_v19 }
  0x4a   : > { %1564 = vmatmul.mubr.msk.bf16.gmra.mrb[4].mxu1 %vm345_vm0, %v1817_v29  ;;  %v978_v29 = vrot.slane %v1855_v21, 3 }
  0x4b   : > { %1567 = vmatprep.mubr.msk.bf16.mxu1 %vm345_vm0, %v1820_v34 }
  0x4c   : > { %1600 = vmatmul.mubr.msk.bf16.gmra.mrb[4].mxu0 %vm345_vm0, %v971_v57  ;;  %v979_v34 = vsel %vm962_vm3, %v976_v19, %v978_v29 }
  0x4d   : > { %1603 = vmatprep.mubr.msk.bf16.mxu0 %vm345_vm0, %v973_v58 }
  0x52   : > { %1568 = vmatmul.mubr.msk.bf16.gmra.mrb[8].mxu1 %vm345_vm0, %v1822_v39  ;;  %v1919_v39 = vld [vmem:[%s1963_s3] ss:$0 sm:$0xff] }
  0x53   : > { %1571 = vmatprep.mubr.msk.bf16.mxu1 %vm345_vm0, %v1826_v44 }
  0x54   : > { %1604 = vmatmul.mubr.msk.bf16.gmra.mrb[8].mxu0 %vm345_vm0, %v975_v59 }
  0x55   : > { %1607 = vmatprep.mubr.msk.bf16.mxu0 %vm345_vm0, %v977_v60 }
  0x5a   : > { %1572 = vmatmul.mubr.msk.bf16.gmra.mrb[12].mxu1 %vm345_vm0, %v1845_v1 }
  0x5c   : > { %1608 = vmatmul.mubr.msk.bf16.gmra.mrb[12].mxu0 %vm345_vm0, %v979_v34 }
 0x115   : > { %v1561_v61 = vpop.f32.mrb[0].mxu1 }
 0x116   : > { %v692_v44 = vpop.f32.mrb[1].mxu1 }
 0x117   : > { %v1597_v62 = vpop.f32.mrb[0].mxu0  ;;  %v1562_v2 = vpop.f32.mrb[2].mxu1 }
 0x118   : > { %v1611_v63 = vadd.f32 %v1597_v62, %v1561_v61  ;;  %v1044_v0 = vpop.f32.mrb[1].mxu0  ;;  %v695_v6 = vpop.f32.mrb[3].mxu1 }
 0x119   : > { %v1612_v4 = vadd.f32 %v1044_v0, %v692_v44  ;;  %v1598_v5 = vpop.f32.mrb[2].mxu0 }
 0x11a   : > { %v1132_v7 = vadd.f32 %v1611_v63, %v1919_v39  ;;  %v1613_v1 = vadd.f32 %v1598_v5, %v1562_v2  ;;  %v1047_v3 = vpop.f32.mrb[3].mxu0 }
 0x11b   : > { %v1130_v8 = vadd.f32 %v1612_v4, %v1919_v39  ;;  %v1614_v9 = vadd.f32 %v1047_v3, %v695_v6 }
 0x11c   : > { %v1133_v10 = vadd.f32 %v1613_v1, %v1919_v39  ;;  %v1148_v14 = vmax.f32 %v1132_v7, 0.0 }
 0x11d   : > { %v1131_v11 = vadd.f32 %v1614_v9, %v1919_v39  ;;  %v1565_v16 = vpop.f32.mrb[4].mxu1  ;;  %v1146_v17 = vmax.f32 %v1130_v8, 0.0 }
 0x11e   : > { %v1149_v15 = vmax.f32 %v1133_v10, 0.0  ;;  %v708_v21 = vpop.f32.mrb[5].mxu1 }
 0x11f   : > { %v1147_v18 = vmax.f32 %v1131_v11, 0.0  ;;  %v1601_v20 = vpop.f32.mrb[4].mxu0  ;;  %v1566_v25 = vpop.f32.mrb[6].mxu1 }
 0x120   : > { %v1463_v22 = vpack.c.bf16 %v1149_v15, %v1148_v14  ;;  %v1615_v23 = vadd.f32 %v1601_v20, %v1565_v16  ;;  %v1060_v24 = vpop.f32.mrb[5].mxu0  ;;  %v711_v30 = vpop.f32.mrb[7].mxu1 }
 0x121   : > { %v1458_v26 = vpack.c.bf16 %v1147_v18, %v1146_v17  ;;  %v1616_v27 = vadd.f32 %v1060_v24, %v708_v21  ;;  %v1602_v28 = vpop.f32.mrb[6].mxu0 }
 0x122   : > { %1496 = vst [vmem:[%s1929_s14 + $0x8] sm:$0xff] %v1463_v22   ;;  %v1136_v31 = vadd.f32 %v1615_v23, %v1919_v39  ;;  %v1617_v32 = vadd.f32 %v1602_v28, %v1566_v25  ;;  %v1063_v33 = vpop.f32.mrb[7].mxu0 }
 0x123   : > { %1459 = vst [vmem:[%s1929_s14] sm:$0xff] %v1458_v26   ;;  %v1134_v35 = vadd.f32 %v1616_v27, %v1919_v39  ;;  %v1618_v36 = vadd.f32 %v1063_v33, %v711_v30 }
 0x124   : > { %v1137_v37 = vadd.f32 %v1617_v32, %v1919_v39  ;;  %v1152_v40 = vmax.f32 %v1136_v31, 0.0 }
 0x125   : > { %v1135_v38 = vadd.f32 %v1618_v36, %v1919_v39  ;;  %v1569_v42 = vpop.f32.mrb[8].mxu1  ;;  %v1150_v43 = vmax.f32 %v1134_v35, 0.0 }
 0x126   : > { %v1153_v41 = vmax.f32 %v1137_v37, 0.0  ;;  %v724_v47 = vpop.f32.mrb[9].mxu1 }
 0x127   : > { %v1151_v45 = vmax.f32 %v1135_v38, 0.0  ;;  %v1605_v46 = vpop.f32.mrb[8].mxu0  ;;  %v1570_v51 = vpop.f32.mrb[10].mxu1 }
 0x128   : > { %v1473_v48 = vpack.c.bf16 %v1153_v41, %v1152_v40  ;;  %v1619_v49 = vadd.f32 %v1605_v46, %v1569_v42  ;;  %v1076_v50 = vpop.f32.mrb[9].mxu0  ;;  %v727_v55 = vpop.f32.mrb[11].mxu1 }
 0x129   : > { %v1468_v52 = vpack.c.bf16 %v1151_v45, %v1150_v43  ;;  %v1620_v53 = vadd.f32 %v1076_v50, %v724_v47  ;;  %v1606_v54 = vpop.f32.mrb[10].mxu0 }
 0x12a   : > { %1498 = vst [vmem:[%s1929_s14 + $0x18] sm:$0xff] %v1473_v48   ;;  %v1140_v12 = vadd.f32 %v1619_v49, %v1919_v39  ;;  %v1621_v56 = vadd.f32 %v1606_v54, %v1570_v51  ;;  %v1079_v57 = vpop.f32.mrb[11].mxu0 }
 0x12b   : > { %1497 = vst [vmem:[%s1929_s14 + $0x10] sm:$0xff] %v1468_v52   ;;  %v1138_v58 = vadd.f32 %v1620_v53, %v1919_v39  ;;  %v1622_v13 = vadd.f32 %v1079_v57, %v727_v55 }
 0x12c   : > { %v1141_v19 = vadd.f32 %v1621_v56, %v1919_v39  ;;  %v1156_v60 = vmax.f32 %v1140_v12, 0.0 }
 0x12d   : > { %v1139_v59 = vadd.f32 %v1622_v13, %v1919_v39  ;;  %v1573_v34 = vpop.f32.mrb[12].mxu1  ;;  %v1154_v61 = vmax.f32 %v1138_v58, 0.0 }
 0x12e   : > { %v1157_v29 = vmax.f32 %v1141_v19, 0.0  ;;  %v740_v63 = vpop.f32.mrb[13].mxu1 }
 0x12f   : > { %v1155_v62 = vmax.f32 %v1139_v59, 0.0  ;;  %v1609_v44 = vpop.f32.mrb[12].mxu0  ;;  %v1574_v5 = vpop.f32.mrb[14].mxu1 }
 0x130   : > { %v1483_v0 = vpack.c.bf16 %v1157_v29, %v1156_v60  ;;  %v1623_v2 = vadd.f32 %v1609_v44, %v1573_v34  ;;  %v1092_v4 = vpop.f32.mrb[13].mxu0  ;;  %v743_v3 = vpop.f32.mrb[15].mxu1 }
 0x131   : > { %v1478_v6 = vpack.c.bf16 %v1155_v62, %v1154_v61  ;;  %v1624_v7 = vadd.f32 %v1092_v4, %v740_v63  ;;  %v1610_v1 = vpop.f32.mrb[14].mxu0 }
 0x132   : > { %1500 = vst [vmem:[%s1929_s14 + $0x28] sm:$0xff] %v1483_v0   ;;  %v1144_v8 = vadd.f32 %v1623_v2, %v1919_v39  ;;  %v1625_v9 = vadd.f32 %v1610_v1, %v1574_v5  ;;  %v1095_v10 = vpop.f32.mrb[15].mxu0 }
 0x133   : > { %1499 = vst [vmem:[%s1929_s14 + $0x20] sm:$0xff] %v1478_v6   ;;  %v1142_v11 = vadd.f32 %v1624_v7, %v1919_v39  ;;  %v1626_v14 = vadd.f32 %v1095_v10, %v743_v3 }
 0x134   : > { %v1145_v15 = vadd.f32 %v1625_v9, %v1919_v39  ;;  %v1160_v17 = vmax.f32 %v1144_v8, 0.0 }
 0x135   : > { %v1143_v16 = vadd.f32 %v1626_v14, %v1919_v39  ;;  %v1158_v20 = vmax.f32 %v1142_v11, 0.0 }
 0x136   : > { %v1161_v18 = vmax.f32 %v1145_v15, 0.0 }
 0x137   : > { %v1159_v21 = vmax.f32 %v1143_v16, 0.0 }
 0x138   : > { %v1493_v22 = vpack.c.bf16 %v1161_v18, %v1160_v17 }
 0x139   : > { %v1488_v23 = vpack.c.bf16 %v1159_v21, %v1158_v20 }
 0x13a   : > { %1502 = vst [vmem:[%s1929_s14 + $0x38] sm:$0xff] %v1493_v22  }
 0x13b   : > { %1501 = vst [vmem:[%s1929_s14 + $0x30] sm:$0xff] %v1488_v23  }
 0x13c PF: > { %s14_s17 = sadd.s32 1, %s1725_s17   ;;  %s1965_s15 = smov %s1721_s16 }
 0x13d   : > { %p11_p5 = scmp.ge.s32.totalorder %s14_s17, 4   ;;  %s1966_s16 = smov %s1968_s18 }
 0x13f   :  { %13 = sbr.rel (!%p11_p5) target bundleno = 2 (0x2), region = 72 }

// kernel: _lambda_.6
= control target key start
LH: loop header
LB: loop body
LE: loop exit
PB: predicated region body
PF: predicated region fallthrough
CT: control target
= control target key end

     0   :  { %s1810_s15 = smov 0   ;;  %s1812_s16 = smov 0   ;;  %s2040_s0 = inlined_call_operand.vmem [shape: bf16[2,256,32], index: 0, kind: input, shape index: {}, may-alias: {0,1}]   ;;  %s2041_s1 = inlined_call_operand.vmem [shape: bf16[2,256,32], index: 1, kind: input, shape index: {}, may-alias: {0,1}]   ;;  %s2042_s2 = inlined_call_operand.vmem [shape: bf16[4,32,128], index: 2, kind: input, shape index: {}]   ;;  %s2043_s3 = inlined_call_operand.vmem [shape: f32[1,128], index: 3, kind: input, shape index: {}]   ;;  %s2044_s4 = inlined_call_operand.vmem [shape: bf16[2,128,128], index: 4, kind: output, shape index: {}]  }
   0x1   :  { %s1814_s17 = smov 0  }
   0x2 LB: > { %s26_s18 = sadd.s32 1, %s1779_s16  ;;  %p1383_p0 = scmp.ge.s32.totalorder %s1783_s17, 1  ;;  %s1783_s17 = sphi %s1814_s17, %s14_s17   ;;  %s1779_s16 = sphi %s1812_s16, %s2046_s16   ;;  %s1775_s15 = sphi %s1810_s15, %s2045_s15  }
   0x3   : > { %p28_p1 = scmp.ge.s32.totalorder %s26_s18, 2  ;;  %p204_p2 = scmp.lt.s32.totalorder %s1783_s17, 3 }
   0x5   : > { %s2048_s18 = smov (%p28_p1, %s26_s18), 0  ;;  %p205_p3 = pnand %p1383_p0, %p204_p2 }
   0x6   : > { %v1737_v0 = vld [vmem:[%s2042_s2 + $0x10] sm:$0xff] (!%p205_p3)   ;;  %p249_p4 = scmp.lt.s32.totalorder (!%p205_p3), %s1775_s15, 1  ;;  %v1738_v1 = vld [vmem:[%s2042_s2 + $0x20] sm:$0xff] (!%p205_p3)   ;;  %v1739_v2 = vld [vmem:[%s2042_s2 + $0x18] sm:$0xff] (!%p205_p3)   ;;  %vm345_vm0 = vcmask (!%p205_p3), 261120   ;;  %vm988_vm3 = vcmask (!%p205_p3), 1045504  }
   0x7   : > { %208 = sbr.rel (%p205_p3) target bundleno = 316 (0x13c), region = 36  ;;  %1585 = vmatprep.subr.bf16.mxu1 (!%p205_p3), %v1737_v0  ;;  %1625 = vmatprep.subr.bf16.mxu0 (!%p205_p3), %v1738_v1  ;;  %v1740_v3 = vld [vmem:[%s2042_s2 + $0x28] sm:$0xff] (!%p205_p3)   ;;  %v1846_v4 = vld [vmem:[%s2042_s2] sm:$0xff] (!%p205_p3)   ;;  %v1859_v7 = vld [vmem:[%s2042_s2 + $0x30] sm:$0xff] (!%p205_p3)   ;;  %vm444_vm1 = vsmask.f32 (!%p205_p3), 7424 }
   0x8   : > { %1586 = vmatpush3.bf16.msra.mxu1 (!%p205_p3), %v1737_v0  ;;  %1626 = vmatpush3.bf16.msra.mxu0 (!%p205_p3), %v1738_v1  ;;  %vm778_vm2 = vsmask.f32 (!%p205_p3), 6400  ;;  %v1749_v44 = vld [vmem:[%s2042_s2 + $0x8] sm:$0xff] (!%p205_p3)   ;;  %v1750_v49 = vld [vmem:[%s2042_s2 + $0x38] sm:$0xff] (!%p205_p3)  }
   0x9   : > { %1587 = vmatprep.subr.bf16.mxu1 (!%p205_p3), %v1739_v2  ;;  %1627 = vmatprep.subr.bf16.mxu0 (!%p205_p3), %v1740_v3 }
   0xc   : > { %1588 = vmatpush3.bf16.msra.mxu1 (!%p205_p3), %v1739_v2  ;;  %1628 = vmatpush3.bf16.msra.mxu0 (!%p205_p3), %v1740_v3 }
   0xd   : > { %1605 = vmatprep.subr.bf16.mxu1 (!%p205_p3), %v1846_v4  ;;  %1645 = vmatprep.subr.bf16.mxu0 (!%p205_p3), %v1859_v7 }
   0xe   : > { %s2050_s15 = smov (!%p249_p4, %s1775_s15), 1 }
   0xf   : > { %s1477_s27 = sshll.u32 %s2050_s15, 7  ;;  %s1480_s23 = sshll.u32 %s2050_s15, 6 }
  0x10   : > { %s1851_s6 = scalar_lea.vmem %s2040_s0, %s1477_s27  ;;  %s1479_s9 = sadd.s32 64, %s1477_s27 }
  0x11   : > { %v1741_v5 = vld [vmem:[%s1851_s6] sm:$0xff]   ;;  %v1742_v6 = vld [vmem:[%s1851_s6 + $0x8] sm:$0xff]   ;;  %v1745_v8 = vld [vmem:[%s1851_s6 + $0x10] sm:$0xff]   ;;  %s267_s12 = scalar_lea.vmem %s2041_s1, %s1479_s9  ;;  %s2009_s26 = scalar_lea.vmem %s2044_s4, %s1480_s23 }
  0x12   : > { %346 = vst.msk [vmem:[#allocation2] sm:$0xff] %vm345_vm0, %v1741_v5  ;;  %347 = vst.msk [vmem:[#allocation2 + $0x8] sm:$0xff] %vm345_vm0, %v1742_v6  ;;  %v1746_v9 = vld [vmem:[%s1851_s6 + $0x18] sm:$0xff]   ;;  %v1747_v10 = vld [vmem:[%s1851_s6 + $0x20] sm:$0xff]  }
  0x13   : > { %348 = vst.msk [vmem:[#allocation2 + $0x10] sm:$0xff] %vm345_vm0, %v1745_v8  ;;  %349 = vst.msk [vmem:[#allocation2 + $0x18] sm:$0xff] %vm345_vm0, %v1746_v9  ;;  %v1748_v11 = vld [vmem:[%s1851_s6 + $0x28] sm:$0xff]   ;;  %v1751_v12 = vld [vmem:[%s1851_s6 + $0x30] sm:$0xff]  }
  0x14   : > { %350 = vst.msk [vmem:[#allocation2 + $0x20] sm:$0xff] %vm345_vm0, %v1747_v10  ;;  %351 = vst.msk [vmem:[#allocation2 + $0x28] sm:$0xff] %vm345_vm0, %v1748_v11  ;;  %v1752_v23 = vld [vmem:[%s1851_s6 + $0x38] sm:$0xff]   ;;  %v1753_v29 = vld [vmem:[%s267_s12] sm:$0xff]  }
  0x15   : > { %352 = vst.msk [vmem:[#allocation2 + $0x30] sm:$0xff] %vm345_vm0, %v1751_v12  ;;  %353 = vst.msk [vmem:[#allocation2 + $0x38] sm:$0xff] %vm345_vm0, %v1752_v23 }
  0x16   : > { %418 = vst.msk [vmem:[#allocation2 + $0x40] sm:$0xff] %vm345_vm0, %v1753_v29 }
  0x19   : > { %v1873_v13 = vld [vmem:[#allocation2] sm:$0xff]  ;;  %v1875_v14 = vld [vmem:[#allocation2 + $0x8] sm:$0xff] }
  0x1a   : > { %v771_v15 = vld [vmem:[#allocation2] sm:$0xfe]  ;;  %v446_v16 = vshrl.u32 %v1873_v13, 16  ;;  %v448_v17 = vshll.u32 %v1873_v13, 16  ;;  %v453_v18 = vshll.u32 %v1875_v14, 16  ;;  %v457_v19 = vshrl.u32 %v1875_v14, 16 }
  0x1b   : > { %v780_v20 = vshrl.u32 %v771_v15, 16  ;;  %v783_v21 = vshll.u32 %v771_v15, 16  ;;  %v1885_v22 = vld [vmem:[#allocation2 + $0x10] sm:$0xff]  ;;  %v1888_v28 = vld [vmem:[#allocation2 + $0x18] sm:$0xff]  ;;  %v1892_v34 = vld [vmem:[#allocation2 + $0x20] sm:$0xff] }
  0x1c   : > { %v450_v24 = vrot.slane %v448_v17, 1  ;;  %v455_v25 = vrot.slane %v453_v18, 1  ;;  %v787_v26 = vrot.slane %v457_v19, 1  ;;  %v788_v27 = vrot.slane %v453_v18, 2  ;;  %v1896_v39 = vld [vmem:[#allocation2 + $0x28] sm:$0xff]  ;;  %v1910_v54 = vld [vmem:[#allocation2 + $0x30] sm:$0xff] }
  0x1d   : > { %v782_v30 = vrot.slane %v780_v20, 1  ;;  %v785_v31 = vrot.slane %v783_v21, 2  ;;  %v461_v32 = vshll.u32 %v1885_v22, 16  ;;  %v465_v33 = vshrl.u32 %v1885_v22, 16  ;;  %v1923_v3 = vld [vmem:[#allocation2 + $0x38] sm:$0xff] }
  0x1e   : > { %v451_v35 = vor.u32 %v450_v24, %v446_v16  ;;  %v459_v36 = vor.u32 %v457_v19, %v455_v25  ;;  %v789_v37 = vor.u32 %v788_v27, %v787_v26  ;;  %v469_v38 = vshll.u32 %v1888_v28, 16  ;;  %v1937_v26 = vld [vmem:[#allocation2 + $0x40] sm:$0x3] }
  0x1f   : > { %v786_v40 = vor.u32 %v785_v31, %v782_v30  ;;  %v463_v41 = vrot.slane %v461_v32, 1  ;;  %v791_v42 = vrot.slane %v465_v33, 1  ;;  %v792_v43 = vrot.slane %v461_v32, 2  ;;  %v438_v32 = vld [vmem:[#allocation2 + $0x40] sm:$0x1] }
  0x20   : > { %v456_v45 = vsel %vm444_vm1, %v451_v35, %v455_v25  ;;  %v471_v46 = vrot.slane %v469_v38, 1  ;;  %v473_v47 = vshrl.u32 %v1888_v28, 16  ;;  %v796_v48 = vrot.slane %v469_v38, 2 }
  0x21   : > { %1589 = vmatprep.mubr.msk.bf16.mxu1 %vm345_vm0, %v456_v45  ;;  %v790_v50 = vsel %vm778_vm2, %v786_v40, %v789_v37  ;;  %v464_v51 = vsel %vm444_vm1, %v459_v36, %v463_v41  ;;  %v793_v52 = vor.u32 %v792_v43, %v791_v42  ;;  %v467_v53 = vor.u32 %v465_v33, %v463_v41 }
  0x22   : > { %1629 = vmatprep.mubr.msk.bf16.mxu0 %vm345_vm0, %v790_v50  ;;  %1590 = vmatmul.mubr.msk.bf16.vlgmr.msra.gmra.mrb[0].mxu1 %vm345_vm0, %v464_v51  ;;  %v795_v55 = vrot.slane %v473_v47, 1  ;;  %v475_v56 = vor.u32 %v473_v47, %v471_v46  ;;  %v477_v57 = vshll.u32 %v1892_v34, 16  ;;  %v481_v58 = vshrl.u32 %v1892_v34, 16 }
  0x23   : > { %1606 = vmatpush3.bf16.msra.mxu1 %v1846_v4  ;;  %v794_v59 = vsel %vm778_vm2, %v789_v37, %v793_v52  ;;  %v472_v60 = vsel %vm444_vm1, %v467_v53, %v471_v46  ;;  %v485_v61 = vshll.u32 %v1896_v39, 16  ;;  %v489_v62 = vshrl.u32 %v1896_v39, 16 }
  0x24   : > { %1630 = vmatmul.mubr.msk.bf16.vlgmr.msra.gmra.mrb[0].mxu0 %vm345_vm0, %v794_v59  ;;  %1593 = vmatprep.mubr.msk.bf16.mxu1 %vm345_vm0, %v472_v60  ;;  %v797_v63 = vor.u32 %v796_v48, %v795_v55  ;;  %v479_v0 = vrot.slane %v477_v57, 1  ;;  %v799_v1 = vrot.slane %v481_v58, 1  ;;  %v800_v2 = vrot.slane %v477_v57, 2  ;;  %v973_v48 = vld [vmem:[#allocation2] sm:$0xfc] }
  0x25   : > { %1646 = vmatpush3.bf16.msra.mxu0 %v1859_v7  ;;  %v487_v4 = vrot.slane %v485_v61, 1  ;;  %1607 = vmatprep.subr.bf16.mxu1 %v1749_v44  ;;  %v803_v5 = vrot.slane %v489_v62, 1  ;;  %v804_v6 = vrot.slane %v485_v61, 2  ;;  %v493_v8 = vshll.u32 %v1910_v54, 16 }
  0x26   : > { %v798_v9 = vsel %vm778_vm2, %v793_v52, %v797_v63  ;;  %v801_v10 = vor.u32 %v800_v2, %v799_v1  ;;  %v483_v11 = vor.u32 %v481_v58, %v479_v0  ;;  %1647 = vmatprep.subr.bf16.mxu0 %v1750_v49  ;;  %v480_v12 = vsel %vm444_vm1, %v475_v56, %v479_v0 }
  0x27   : > { %1633 = vmatprep.mubr.msk.bf16.mxu0 %vm345_vm0, %v798_v9  ;;  %v805_v15 = vor.u32 %v804_v6, %v803_v5  ;;  %1608 = vmatpush3.bf16.msra.mxu1 %v1749_v44  ;;  %v497_v16 = vshrl.u32 %v1910_v54, 16  ;;  %v501_v17 = vshll.u32 %v1923_v3, 16  ;;  %v808_v20 = vrot.slane %v493_v8, 2 }
  0x28   : > { %v488_v7 = vsel %vm444_vm1, %v483_v11, %v487_v4  ;;  %v802_v18 = vsel %vm778_vm2, %v797_v63, %v801_v10  ;;  %v495_v23 = vrot.slane %v493_v8, 1  ;;  %v505_v24 = vshrl.u32 %v1923_v3, 16 }
  0x29   : > { %v807_v19 = vrot.slane %v497_v16, 1  ;;  %1648 = vmatpush3.bf16.msra.mxu0 %v1750_v49  ;;  %v806_v21 = vsel %vm778_vm2, %v801_v10, %v805_v15  ;;  %v812_v25 = vrot.slane %v501_v17, 2  ;;  %v491_v27 = vor.u32 %v489_v62, %v487_v4 }
  0x2a   : > { %1594 = vmatmul.mubr.msk.bf16.gmra.mrb[4].mxu1 %vm345_vm0, %v480_v12  ;;  %v499_v29 = vor.u32 %v497_v16, %v495_v23  ;;  %v503_v30 = vrot.slane %v501_v17, 1  ;;  %v811_v31 = vrot.slane %v505_v24, 1  ;;  %v816_v35 = vshrl.u32 %v1937_v26, 16 }
  0x2b   : > { %1597 = vmatprep.mubr.msk.bf16.mxu1 %vm345_vm0, %v488_v7  ;;  %v809_v33 = vor.u32 %v808_v20, %v807_v19  ;;  %v819_v36 = vshll.u32 %v1937_v26, 16  ;;  %v496_v38 = vsel %vm444_vm1, %v491_v27, %v495_v23  ;;  %v509_v40 = vshll.u32 %v438_v32, 16 }
  0x2c   : > { %1634 = vmatmul.mubr.msk.bf16.gmra.mrb[4].mxu0 %vm345_vm0, %v802_v18  ;;  %v813_v37 = vor.u32 %v812_v25, %v811_v31  ;;  %v504_v41 = vsel %vm444_vm1, %v499_v29, %v503_v30  ;;  %v818_v43 = vrot.slane %v816_v35, 1  ;;  %v507_v46 = vor.u32 %v505_v24, %v503_v30 }
  0x2d   : > { %1637 = vmatprep.mubr.msk.bf16.mxu0 %vm345_vm0, %v806_v21  ;;  %v810_v42 = vsel %vm778_vm2, %v805_v15, %v809_v33  ;;  %v821_v44 = vrot.slane %v819_v36, 2  ;;  %v511_v47 = vrot.slane %v509_v40, 1  ;;  %v989_v50 = vrot.slane %v973_v48, 2 }
  0x2e   : > { %v814_v45 = vsel %vm778_vm2, %v809_v33, %v813_v37  ;;  %v990_v51 = vrot.slane %v1875_v14, 2  ;;  %v992_v56 = vrot.slane %v1885_v22, 2  ;;  %v994_v57 = vrot.slane %v1888_v28, 2 }
  0x2f   : > { %v822_v49 = vor.u32 %v821_v44, %v818_v43  ;;  %v512_v52 = vsel %vm444_vm1, %v507_v46, %v511_v47  ;;  %v998_v60 = vrot.slane %v1896_v39, 2  ;;  %v1002_v62 = vrot.slane %v1923_v3, 2 }
  0x30   : > { %v991_v55 = vsel %vm988_vm3, %v989_v50, %v990_v51  ;;  %v993_v58 = vsel %vm988_vm3, %v990_v51, %v992_v56  ;;  %v995_v59 = vsel %vm988_vm3, %v992_v56, %v994_v57 }
  0x31   : > { %v823_v53 = vsel %vm778_vm2, %v813_v37, %v822_v49 }
  0x32   : > { %1598 = vmatmul.mubr.msk.bf16.gmra.mrb[8].mxu1 %vm345_vm0, %v496_v38 }
  0x33   : > { %1601 = vmatprep.mubr.msk.bf16.mxu1 %vm345_vm0, %v504_v41 }
  0x34   : > { %1638 = vmatmul.mubr.msk.bf16.gmra.mrb[8].mxu0 %vm345_vm0, %v810_v42 }
  0x35   : > { %1641 = vmatprep.mubr.msk.bf16.mxu0 %vm345_vm0, %v814_v45 }
  0x3a   : > { %1602 = vmatmul.mubr.msk.bf16.gmra.mrb[12].mxu1 %vm345_vm0, %v512_v52 }
  0x3b   : > { %1609 = vmatprep.mubr.msk.bf16.mxu1 %vm345_vm0, %v1873_v13  ;;  %v996_v13 = vrot.slane %v1892_v34, 2 }
  0x3c   : > { %1642 = vmatmul.mubr.msk.bf16.gmra.mrb[12].mxu0 %vm345_vm0, %v823_v53 }
  0x3d   : > { %1649 = vmatprep.mubr.msk.bf16.mxu0 %vm345_vm0, %v991_v55  ;;  %v997_v61 = vsel %vm988_vm3, %v994_v57, %v996_v13 }
  0x42   : > { %1610 = vmatmul.mubr.msk.bf16.vlgmr.msra.gmra.mrb[0].mxu1 %vm345_vm0, %v1875_v14  ;;  %v999_v14 = vsel %vm988_vm3, %v996_v13, %v998_v60 }
  0x43   : > { %1613 = vmatprep.mubr.msk.bf16.mxu1 %vm345_vm0, %v1885_v22  ;;  %v1000_v22 = vrot.slane %v1910_v54, 2 }
  0x44   : > { %1650 = vmatmul.mubr.msk.bf16.vlgmr.msra.gmra.mrb[0].mxu0 %vm345_vm0, %v993_v58 }
  0x45   : > { %1653 = vmatprep.mubr.msk.bf16.mxu0 %vm345_vm0, %v995_v59  ;;  %v1001_v63 = vsel %vm988_vm3, %v998_v60, %v1000_v22 }
  0x4a   : > { %1614 = vmatmul.mubr.msk.bf16.gmra.mrb[4].mxu1 %vm345_vm0, %v1888_v28  ;;  %v1003_v28 = vsel %vm988_vm3, %v1000_v22, %v1002_v62 }
  0x4b   : > { %1617 = vmatprep.mubr.msk.bf16.mxu1 %vm345_vm0, %v1892_v34  ;;  %v1004_v34 = vrot.slane %v1937_v26, 2 }
  0x4c   : > { %1654 = vmatmul.mubr.msk.bf16.gmra.mrb[4].mxu0 %vm345_vm0, %v997_v61 }
  0x4d   : > { %1657 = vmatprep.mubr.msk.bf16.mxu0 %vm345_vm0, %v999_v14  ;;  %v1005_v0 = vsel %vm988_vm3, %v1002_v62, %v1004_v34 }
  0x52   : > { %1618 = vmatmul.mubr.msk.bf16.gmra.mrb[8].mxu1 %vm345_vm0, %v1896_v39 }
  0x53   : > { %1621 = vmatprep.mubr.msk.bf16.mxu1 %vm345_vm0, %v1910_v54  ;;  %v1999_v54 = vld [vmem:[%s2043_s3] ss:$0 sm:$0xff] }
  0x54   : > { %1658 = vmatmul.mubr.msk.bf16.gmra.mrb[8].mxu0 %vm345_vm0, %v1001_v63 }
  0x55   : > { %1661 = vmatprep.mubr.msk.bf16.mxu0 %vm345_vm0, %v1003_v28 }
  0x5a   : > { %1622 = vmatmul.mubr.msk.bf16.gmra.mrb[12].mxu1 %vm345_vm0, %v1923_v3 }
  0x5c   : > { %1662 = vmatmul.mubr.msk.bf16.gmra.mrb[12].mxu0 %vm345_vm0, %v1005_v0 }
 0x115   : > { %v1611_v39 = vpop.f32.mrb[0].mxu1 }
 0x116   : > { %v708_v1 = vpop.f32.mrb[1].mxu1 }
 0x117   : > { %v1651_v2 = vpop.f32.mrb[0].mxu0  ;;  %v1612_v4 = vpop.f32.mrb[2].mxu1 }
 0x118   : > { %v1665_v5 = vadd.f32 %v1651_v2, %v1611_v39  ;;  %v1076_v6 = vpop.f32.mrb[1].mxu0  ;;  %v711_v8 = vpop.f32.mrb[3].mxu1 }
 0x119   : > { %v1666_v9 = vadd.f32 %v1076_v6, %v708_v1  ;;  %v1652_v10 = vpop.f32.mrb[2].mxu0 }
 0x11a   : > { %v1164_v11 = vadd.f32 %v1665_v5, %v1999_v54  ;;  %v1667_v3 = vadd.f32 %v1652_v10, %v1612_v4  ;;  %v1079_v12 = vpop.f32.mrb[3].mxu0 }
 0x11b   : > { %v1162_v15 = vadd.f32 %v1666_v9, %v1999_v54  ;;  %v1668_v16 = vadd.f32 %v1079_v12, %v711_v8 }
 0x11c   : > { %v1165_v7 = vadd.f32 %v1667_v3, %v1999_v54  ;;  %v1180_v19 = vmax.f32 %v1164_v11, 0.0 }
 0x11d   : > { %v1163_v17 = vadd.f32 %v1668_v16, %v1999_v54  ;;  %v1615_v18 = vpop.f32.mrb[4].mxu1  ;;  %v1178_v23 = vmax.f32 %v1162_v15, 0.0 }
 0x11e   : > { %v1181_v20 = vmax.f32 %v1165_v7, 0.0  ;;  %v724_v21 = vpop.f32.mrb[5].mxu1 }
 0x11f   : > { %v1179_v24 = vmax.f32 %v1163_v17, 0.0  ;;  %v1655_v25 = vpop.f32.mrb[4].mxu0  ;;  %v1616_v26 = vpop.f32.mrb[6].mxu1 }
 0x120   : > { %v1505_v27 = vpack.c.bf16 %v1181_v20, %v1180_v19  ;;  %v1669_v29 = vadd.f32 %v1655_v25, %v1615_v18  ;;  %v1092_v30 = vpop.f32.mrb[5].mxu0  ;;  %v727_v31 = vpop.f32.mrb[7].mxu1 }
 0x121   : > { %v1500_v32 = vpack.c.bf16 %v1179_v24, %v1178_v23  ;;  %v1670_v33 = vadd.f32 %v1092_v30, %v724_v21  ;;  %v1656_v35 = vpop.f32.mrb[6].mxu0 }
 0x122   : > { %1538 = vst [vmem:[%s2009_s26 + $0x8] sm:$0xff] %v1505_v27   ;;  %v1168_v36 = vadd.f32 %v1669_v29, %v1999_v54  ;;  %v1671_v37 = vadd.f32 %v1656_v35, %v1616_v26  ;;  %v1095_v38 = vpop.f32.mrb[7].mxu0 }
 0x123   : > { %1501 = vst [vmem:[%s2009_s26] sm:$0xff] %v1500_v32   ;;  %v1166_v40 = vadd.f32 %v1670_v33, %v1999_v54  ;;  %v1672_v41 = vadd.f32 %v1095_v38, %v727_v31 }
 0x124   : > { %v1169_v42 = vadd.f32 %v1671_v37, %v1999_v54  ;;  %v1184_v45 = vmax.f32 %v1168_v36, 0.0 }
 0x125   : > { %v1167_v43 = vadd.f32 %v1672_v41, %v1999_v54  ;;  %v1619_v44 = vpop.f32.mrb[8].mxu1  ;;  %v1182_v48 = vmax.f32 %v1166_v40, 0.0 }
 0x126   : > { %v1185_v46 = vmax.f32 %v1169_v42, 0.0  ;;  %v740_v47 = vpop.f32.mrb[9].mxu1 }
 0x127   : > { %v1183_v49 = vmax.f32 %v1167_v43, 0.0  ;;  %v1659_v50 = vpop.f32.mrb[8].mxu0  ;;  %v1620_v51 = vpop.f32.mrb[10].mxu1 }
 0x128   : > { %v1515_v52 = vpack.c.bf16 %v1185_v46, %v1184_v45  ;;  %v1673_v53 = vadd.f32 %v1659_v50, %v1619_v44  ;;  %v1108_v55 = vpop.f32.mrb[9].mxu0  ;;  %v743_v56 = vpop.f32.mrb[11].mxu1 }
 0x129   : > { %v1510_v57 = vpack.c.bf16 %v1183_v49, %v1182_v48  ;;  %v1674_v58 = vadd.f32 %v1108_v55, %v740_v47  ;;  %v1660_v59 = vpop.f32.mrb[10].mxu0 }
 0x12a   : > { %1540 = vst [vmem:[%s2009_s26 + $0x18] sm:$0xff] %v1515_v52   ;;  %v1172_v13 = vadd.f32 %v1673_v53, %v1999_v54  ;;  %v1675_v60 = vadd.f32 %v1660_v59, %v1620_v51  ;;  %v1111_v61 = vpop.f32.mrb[11].mxu0 }
 0x12b   : > { %1539 = vst [vmem:[%s2009_s26 + $0x10] sm:$0xff] %v1510_v57   ;;  %v1170_v14 = vadd.f32 %v1674_v58, %v1999_v54  ;;  %v1676_v22 = vadd.f32 %v1111_v61, %v743_v56 }
 0x12c   : > { %v1173_v62 = vadd.f32 %v1675_v60, %v1999_v54  ;;  %v1188_v34 = vmax.f32 %v1172_v13, 0.0 }
 0x12d   : > { %v1171_v63 = vadd.f32 %v1676_v22, %v1999_v54  ;;  %v1623_v28 = vpop.f32.mrb[12].mxu1  ;;  %v1186_v1 = vmax.f32 %v1170_v14, 0.0 }
 0x12e   : > { %v1189_v0 = vmax.f32 %v1173_v62, 0.0  ;;  %v756_v39 = vpop.f32.mrb[13].mxu1 }
 0x12f   : > { %v1187_v2 = vmax.f32 %v1171_v63, 0.0  ;;  %v1663_v4 = vpop.f32.mrb[12].mxu0  ;;  %v1624_v5 = vpop.f32.mrb[14].mxu1 }
 0x130   : > { %v1525_v6 = vpack.c.bf16 %v1189_v0, %v1188_v34  ;;  %v1677_v8 = vadd.f32 %v1663_v4, %v1623_v28  ;;  %v1124_v9 = vpop.f32.mrb[13].mxu0  ;;  %v759_v10 = vpop.f32.mrb[15].mxu1 }
 0x131   : > { %v1520_v11 = vpack.c.bf16 %v1187_v2, %v1186_v1  ;;  %v1678_v3 = vadd.f32 %v1124_v9, %v756_v39  ;;  %v1664_v12 = vpop.f32.mrb[14].mxu0 }
 0x132   : > { %1542 = vst [vmem:[%s2009_s26 + $0x28] sm:$0xff] %v1525_v6   ;;  %v1176_v15 = vadd.f32 %v1677_v8, %v1999_v54  ;;  %v1679_v16 = vadd.f32 %v1664_v12, %v1624_v5  ;;  %v1127_v7 = vpop.f32.mrb[15].mxu0 }
 0x133   : > { %1541 = vst [vmem:[%s2009_s26 + $0x20] sm:$0xff] %v1520_v11   ;;  %v1174_v17 = vadd.f32 %v1678_v3, %v1999_v54  ;;  %v1680_v18 = vadd.f32 %v1127_v7, %v759_v10 }
 0x134   : > { %v1177_v19 = vadd.f32 %v1679_v16, %v1999_v54  ;;  %v1192_v21 = vmax.f32 %v1176_v15, 0.0 }
 0x135   : > { %v1175_v20 = vadd.f32 %v1680_v18, %v1999_v54  ;;  %v1190_v24 = vmax.f32 %v1174_v17, 0.0 }
 0x136   : > { %v1193_v23 = vmax.f32 %v1177_v19, 0.0 }
 0x137   : > { %v1191_v25 = vmax.f32 %v1175_v20, 0.0 }
 0x138   : > { %v1535_v26 = vpack.c.bf16 %v1193_v23, %v1192_v21 }
 0x139   : > { %v1530_v27 = vpack.c.bf16 %v1191_v25, %v1190_v24 }
 0x13a   : > { %1544 = vst [vmem:[%s2009_s26 + $0x38] sm:$0xff] %v1535_v26  }
 0x13b   : > { %1543 = vst [vmem:[%s2009_s26 + $0x30] sm:$0xff] %v1530_v27  }
 0x13c PF: > { %s14_s17 = sadd.s32 1, %s1783_s17   ;;  %s2045_s15 = smov %s1779_s16 }
 0x13d   : > { %p11_p5 = scmp.ge.s32.totalorder %s14_s17, 4   ;;  %s2046_s16 = smov %s2048_s18 }
 0x13f   :  { %13 = sbr.rel (!%p11_p5) target bundleno = 2 (0x2), region = 72 }

// kernel: _lambda_.7
= control target key start
LH: loop header
LB: loop body
LE: loop exit
PB: predicated region body
PF: predicated region fallthrough
CT: control target
= control target key end

     0   :  { %s1909_s15 = smov 0   ;;  %s1911_s16 = smov 0   ;;  %s2214_s0 = inlined_call_operand.vmem [shape: bf16[2,256,64], index: 0, kind: input, shape index: {}, may-alias: {0,1}]   ;;  %s2215_s1 = inlined_call_operand.vmem [shape: bf16[2,256,64], index: 1, kind: input, shape index: {}, may-alias: {0,1}]   ;;  %s2216_s2 = inlined_call_operand.vmem [shape: bf16[4,64,128], index: 2, kind: input, shape index: {}]   ;;  %s2217_s3 = inlined_call_operand.vmem [shape: f32[1,128], index: 3, kind: input, shape index: {}]   ;;  %s2218_s4 = inlined_call_operand.vmem [shape: bf16[2,128,128], index: 4, kind: output, shape index: {}]  }
   0x1   :  { %s1913_s17 = smov 0  }
   0x2 LB: > { %s26_s18 = sadd.s32 1, %s1878_s16  ;;  %p1430_p0 = scmp.ge.s32.totalorder %s1882_s17, 1  ;;  %s1882_s17 = sphi %s1913_s17, %s14_s17   ;;  %s1878_s16 = sphi %s1911_s16, %s2220_s16   ;;  %s1874_s15 = sphi %s1909_s15, %s2219_s15  }
   0x3   : > { %p28_p1 = scmp.ge.s32.totalorder %s26_s18, 2  ;;  %p204_p2 = scmp.lt.s32.totalorder %s1882_s17, 3 }
   0x5   : > { %s2222_s18 = smov (%p28_p1, %s26_s18), 0  ;;  %p205_p3 = pnand %p1430_p0, %p204_p2 }
   0x6   : > { %v1828_v0 = vld [vmem:[%s2216_s2 + $0x40] sm:$0xff] (!%p205_p3)   ;;  %p249_p4 = scmp.lt.s32.totalorder (!%p205_p3), %s1874_s15, 1  ;;  %v1830_v2 = vld [vmem:[%s2216_s2 + $0x48] sm:$0xff] (!%p205_p3)   ;;  %v1832_v4 = vld [vmem:[%s2216_s2 + $0x50] sm:$0xff] (!%p205_p3)   ;;  %vm345_vm0 = vcmask (!%p205_p3), 523264   ;;  %vm822_vm1 = vcmask (!%p205_p3), 1046528  }
   0x7   : > { %208 = sbr.rel (%p205_p3) target bundleno = 313 (0x139), region = 36  ;;  %v1829_v1 = vld [vmem:[%s2216_s2 + $0x20] sm:$0xff] (!%p205_p3)   ;;  %1708 = vmatprep.subr.bf16.mxu0 (!%p205_p3), %v1828_v0  ;;  %v1831_v3 = vld [vmem:[%s2216_s2 + $0x28] sm:$0xff] (!%p205_p3)   ;;  %v1833_v5 = vld [vmem:[%s2216_s2 + $0x30] sm:$0xff] (!%p205_p3)   ;;  %vm452_vm2 = vsmask.f32 (!%p205_p3), 7424 }
   0x8   : > { %1709 = vmatpush3.bf16.msra.mxu0 (!%p205_p3), %v1828_v0  ;;  %1660 = vmatprep.subr.bf16.mxu1 (!%p205_p3), %v1829_v1  ;;  %v1834_v6 = vld [vmem:[%s2216_s2 + $0x58] sm:$0xff] (!%p205_p3)   ;;  %v1969_v11 = vld [vmem:[%s2216_s2] sm:$0xff] (!%p205_p3)   ;;  %v1844_v31 = vld [vmem:[%s2216_s2 + $0x68] sm:$0xff] (!%p205_p3)   ;;  %vm1011_vm3 = vsmask.f32 (!%p205_p3), 6400 }
   0x9   : > { %1661 = vmatpush3.bf16.msra.mxu1 (!%p205_p3), %v1829_v1  ;;  %1710 = vmatprep.subr.bf16.mxu0 (!%p205_p3), %v1830_v2  ;;  %v1835_v7 = vld [vmem:[%s2216_s2 + $0x38] sm:$0xff] (!%p205_p3)   ;;  %v1840_v12 = vld [vmem:[%s2216_s2 + $0x60] sm:$0xff] (!%p205_p3)   ;;  %v1843_v44 = vld [vmem:[%s2216_s2 + $0x8] sm:$0xff] (!%p205_p3)  }
   0xa   : > { %1662 = vmatprep.subr.bf16.mxu1 (!%p205_p3), %v1831_v3  ;;  %v1848_v45 = vld [vmem:[%s2216_s2 + $0x70] sm:$0xff] (!%p205_p3)  }
   0xb   : > { %v1847_v63 = vld [vmem:[%s2216_s2 + $0x10] sm:$0xff] (!%p205_p3)  }
   0xc   : > { %1711 = vmatpush3.bf16.msra.mxu0 (!%p205_p3), %v1830_v2 }
   0xd   : > { %1663 = vmatpush3.bf16.msra.mxu1 (!%p205_p3), %v1831_v3  ;;  %1712 = vmatprep.subr.bf16.mxu0 (!%p205_p3), %v1832_v4 }
   0xe   : > { %s2224_s15 = smov (!%p249_p4, %s1874_s15), 1  ;;  %1664 = vmatprep.subr.bf16.mxu1 %v1833_v5 }
   0xf   : > { %s1544_s29 = sshll.u32 %s2224_s15, 7  ;;  %s1547_s13 = sshll.u32 %s2224_s15, 6 }
  0x10   : > { %s1956_s10 = scalar_lea.vmem %s2214_s0, %s1544_s29  ;;  %1713 = vmatpush3.bf16.msra.mxu0 %v1832_v4  ;;  %s2021_s23 = sadd.s32 64, %s1544_s29 }
  0x11   : > { %v1836_v8 = vld [vmem:[%s1956_s10] sm:$0xff]   ;;  %v1837_v9 = vld [vmem:[%s1956_s10 + $0x8] sm:$0xff]   ;;  %v1838_v10 = vld [vmem:[%s1956_s10 + $0x10] sm:$0xff]   ;;  %1665 = vmatpush3.bf16.msra.mxu1 %v1833_v5  ;;  %1714 = vmatprep.subr.bf16.mxu0 %v1834_v6  ;;  %s267_s30 = scalar_lea.vmem %s2215_s1, %s2021_s23  ;;  %s2182_s20 = scalar_lea.vmem %s2218_s4, %s1547_s13 }
  0x12   : > { %346 = vst.msk [vmem:[#allocation2] sm:$0xff] %vm345_vm0, %v1836_v8  ;;  %347 = vst.msk [vmem:[#allocation2 + $0x8] sm:$0xff] %vm345_vm0, %v1837_v9  ;;  %1666 = vmatprep.subr.bf16.mxu1 %v1835_v7  ;;  %v1841_v13 = vld [vmem:[%s1956_s10 + $0x18] sm:$0xff]   ;;  %v1842_v14 = vld [vmem:[%s1956_s10 + $0x20] sm:$0xff]  }
  0x13   : > { %348 = vst.msk [vmem:[#allocation2 + $0x10] sm:$0xff] %vm345_vm0, %v1838_v10  ;;  %349 = vst.msk [vmem:[#allocation2 + $0x18] sm:$0xff] %vm345_vm0, %v1841_v13  ;;  %v1845_v15 = vld [vmem:[%s1956_s10 + $0x28] sm:$0xff]   ;;  %v1846_v22 = vld [vmem:[%s1956_s10 + $0x30] sm:$0xff]  }
  0x14   : > { %1715 = vmatpush3.bf16.msra.mxu0 %v1834_v6  ;;  %350 = vst.msk [vmem:[#allocation2 + $0x20] sm:$0xff] %vm345_vm0, %v1842_v14  ;;  %351 = vst.msk [vmem:[#allocation2 + $0x28] sm:$0xff] %vm345_vm0, %v1845_v15  ;;  %v1849_v55 = vld [vmem:[%s1956_s10 + $0x38] sm:$0xff]   ;;  %v1850_v6 = vld [vmem:[%s267_s30] sm:$0xff]  }
  0x15   : > { %1667 = vmatpush3.bf16.msra.mxu1 %v1835_v7  ;;  %1732 = vmatprep.subr.bf16.mxu0 %v1840_v12  ;;  %352 = vst.msk [vmem:[#allocation2 + $0x30] sm:$0xff] %vm345_vm0, %v1846_v22  ;;  %353 = vst.msk [vmem:[#allocation2 + $0x38] sm:$0xff] %vm345_vm0, %v1849_v55 }
  0x16   : > { %1684 = vmatprep.subr.bf16.mxu1 %v1969_v11  ;;  %418 = vst.msk [vmem:[#allocation2 + $0x40] sm:$0xff] %vm345_vm0, %v1850_v6 }
  0x19   : > { %v1981_v16 = vld [vmem:[#allocation2 + $0x8] sm:$0xff]  ;;  %v1983_v17 = vld [vmem:[#allocation2] sm:$0xfe] }
  0x1a   : > { %v1985_v18 = vld [vmem:[#allocation2] sm:$0xff]  ;;  %v823_v19 = vrot.slane %v1983_v17, 1  ;;  %v824_v20 = vrot.slane %v1981_v16, 1  ;;  %v1989_v21 = vld [vmem:[#allocation2 + $0x10] sm:$0xff]  ;;  %v461_v26 = vshll.u32 %v1981_v16, 16  ;;  %v465_v28 = vshrl.u32 %v1981_v16, 16 }
  0x1b   : > { %v826_v23 = vrot.slane %v1989_v21, 1  ;;  %v454_v24 = vshrl.u32 %v1985_v18, 16  ;;  %v456_v25 = vshll.u32 %v1985_v18, 16  ;;  %v469_v29 = vshll.u32 %v1989_v21, 16  ;;  %v2009_v35 = vld [vmem:[#allocation2 + $0x18] sm:$0xff]  ;;  %v2016_v39 = vld [vmem:[#allocation2 + $0x20] sm:$0xff] }
  0x1c   : > { %v825_v27 = vsel %vm822_vm1, %v823_v19, %v824_v20  ;;  %v473_v30 = vshrl.u32 %v1989_v21, 16  ;;  %v463_v34 = vrot.slane %v461_v26, 1  ;;  %v1013_v36 = vshrl.u32 %v1983_v17, 16  ;;  %v2043_v54 = vld [vmem:[#allocation2 + $0x28] sm:$0xff]  ;;  %v2058_v61 = vld [vmem:[#allocation2 + $0x30] sm:$0xff]  ;;  %v2087_v13 = vld [vmem:[#allocation2 + $0x38] sm:$0xff] }
  0x1d   : > { %1716 = vmatprep.mubr.msk.bf16.mxu0 %vm345_vm0, %v825_v27  ;;  %v827_v32 = vsel %vm822_vm1, %v824_v20, %v826_v23  ;;  %v458_v33 = vrot.slane %v456_v25, 1  ;;  %v471_v37 = vrot.slane %v469_v29, 1  ;;  %v828_v38 = vrot.slane %v2009_v35, 1 }
  0x1e   : > { %1717 = vmatmul.mubr.msk.bf16.vlgmr.msra.gmra.mrb[0].mxu0 %vm345_vm0, %v827_v32  ;;  %v477_v40 = vshll.u32 %v2009_v35, 16  ;;  %v467_v42 = vor.u32 %v465_v28, %v463_v34  ;;  %v830_v43 = vrot.slane %v2016_v39, 1  ;;  %v481_v49 = vshrl.u32 %v2009_v35, 16  ;;  %v442_v32 = vld [vmem:[#allocation2 + $0x40] sm:$0x1] }
  0x1f   : > { %v459_v41 = vor.u32 %v458_v33, %v454_v24  ;;  %1733 = vmatpush3.bf16.msra.mxu0 %v1840_v12  ;;  %v829_v46 = vsel %vm822_vm1, %v826_v23, %v828_v38  ;;  %v475_v47 = vor.u32 %v473_v30, %v471_v37  ;;  %v1016_v50 = vshll.u32 %v1983_v17, 16  ;;  %v1858_v23 = vld [vmem:[%s2216_s2 + $0x18] sm:$0xff]  }
  0x20   : > { %v479_v48 = vrot.slane %v477_v40, 1  ;;  %1734 = vmatprep.subr.bf16.mxu0 %v1844_v31  ;;  %v472_v52 = vsel %vm452_vm2, %v467_v42, %v471_v37  ;;  %1720 = vmatprep.mubr.msk.bf16.mxu0 %vm345_vm0, %v829_v46  ;;  %v485_v53 = vshll.u32 %v2016_v39, 16  ;;  %v832_v57 = vrot.slane %v2043_v54, 1 }
  0x21   : > { %v464_v51 = vsel %vm452_vm2, %v459_v41, %v463_v34  ;;  %v489_v58 = vshrl.u32 %v2016_v39, 16  ;;  %v831_v59 = vsel %vm822_vm1, %v828_v38, %v830_v43  ;;  %v493_v62 = vshll.u32 %v2043_v54, 16 }
  0x22   : > { %1668 = vmatprep.mubr.msk.bf16.mxu1 %vm345_vm0, %v464_v51  ;;  %v480_v56 = vsel %vm452_vm2, %v475_v47, %v479_v48  ;;  %v487_v60 = vrot.slane %v485_v53, 1  ;;  %v483_v0 = vor.u32 %v481_v49, %v479_v48  ;;  %v833_v1 = vsel %vm822_vm1, %v830_v43, %v832_v57 }
  0x23   : > { %1669 = vmatmul.mubr.msk.bf16.vlgmr.msra.gmra.mrb[0].mxu1 %vm345_vm0, %v472_v52  ;;  %1735 = vmatpush3.bf16.msra.mxu0 %v1844_v31  ;;  %v834_v2 = vrot.slane %v2058_v61, 1  ;;  %v497_v3 = vshrl.u32 %v2043_v54, 16  ;;  %v495_v5 = vrot.slane %v493_v62, 1  ;;  %v501_v7 = vshll.u32 %v2058_v61, 16  ;;  %v1859_v31 = vld [vmem:[%s2216_s2 + $0x78] sm:$0xff]  }
  0x24   : > { %1685 = vmatpush3.bf16.msra.mxu1 %v1969_v11  ;;  %1672 = vmatprep.mubr.msk.bf16.mxu1 %vm345_vm0, %v480_v56  ;;  %v491_v4 = vor.u32 %v489_v58, %v487_v60  ;;  %v488_v8 = vsel %vm452_vm2, %v483_v0, %v487_v60  ;;  %v1021_v9 = vrot.slane %v461_v26, 2  ;;  %v505_v11 = vshrl.u32 %v2058_v61, 16 }
  0x25   : > { %1686 = vmatprep.subr.bf16.mxu1 %v1843_v44  ;;  %1736 = vmatprep.subr.bf16.mxu0 %v1848_v45  ;;  %v503_v12 = vrot.slane %v501_v7, 1  ;;  %v1015_v14 = vrot.slane %v1013_v36, 1  ;;  %v1018_v15 = vrot.slane %v1016_v50, 2  ;;  %v835_v17 = vsel %vm822_vm1, %v832_v57, %v834_v2 }
  0x26   : > { %1721 = vmatmul.mubr.msk.bf16.gmra.mrb[4].mxu0 %vm345_vm0, %v831_v59  ;;  %v496_v10 = vsel %vm452_vm2, %v491_v4, %v495_v5  ;;  %v499_v19 = vor.u32 %v497_v3, %v495_v5  ;;  %v836_v20 = vrot.slane %v2087_v13, 1  ;;  %v509_v22 = vshll.u32 %v2087_v13, 16 }
  0x27   : > { %1724 = vmatprep.mubr.msk.bf16.mxu0 %vm345_vm0, %v833_v1  ;;  %1737 = vmatpush3.bf16.msra.mxu0 %v1848_v45  ;;  %v1020_v24 = vrot.slane %v465_v28, 1  ;;  %v507_v26 = vor.u32 %v505_v11, %v503_v12  ;;  %v838_v34 = vrot.slane %v442_v32, 1  ;;  %v513_v28 = vshrl.u32 %v2087_v13, 16  ;;  %v1001_v1 = vld [vmem:[#allocation2 + $0x40] sm:$0x3] }
  0x28   : > { %1687 = vmatpush3.bf16.msra.mxu1 %v1843_v44  ;;  %v837_v25 = vsel %vm822_vm1, %v834_v2, %v836_v20  ;;  %v511_v27 = vrot.slane %v509_v22, 1  ;;  %v504_v33 = vsel %vm452_vm2, %v499_v19, %v503_v12  ;;  %1738 = vmatprep.subr.bf16.mxu0 %v1859_v31  ;;  %v517_v36 = vshll.u32 %v442_v32, 16 }
  0x29   : > { %1688 = vmatprep.subr.bf16.mxu1 %v1847_v63  ;;  %v1019_v37 = vor.u32 %v1018_v15, %v1015_v14  ;;  %v1022_v38 = vor.u32 %v1021_v9, %v1020_v24  ;;  %v1025_v42 = vrot.slane %v469_v29, 2  ;;  %v1024_v43 = vrot.slane %v473_v30, 1 }
  0x2a   : > { %v512_v41 = vsel %vm452_vm2, %v507_v26, %v511_v27  ;;  %v839_v44 = vsel %vm822_vm1, %v836_v20, %v838_v34  ;;  %v1028_v45 = vrot.slane %v481_v49, 1  ;;  %v515_v46 = vor.u32 %v513_v28, %v511_v27 }
  0x2b   : > { %1673 = vmatmul.mubr.msk.bf16.gmra.mrb[4].mxu1 %vm345_vm0, %v488_v8  ;;  %1739 = vmatpush3.bf16.msra.mxu0 %v1859_v31  ;;  %v519_v47 = vrot.slane %v517_v36, 1  ;;  %v1023_v48 = vsel %vm1011_vm3, %v1019_v37, %v1022_v38  ;;  %v1029_v50 = vrot.slane %v477_v40, 2  ;;  %v1026_v29 = vor.u32 %v1025_v42, %v1024_v43 }
  0x2c   : > { %1676 = vmatprep.mubr.msk.bf16.mxu1 %vm345_vm0, %v496_v10  ;;  %1689 = vmatpush3.bf16.msra.mxu1 %v1847_v63  ;;  %v1032_v52 = vrot.slane %v489_v58, 1  ;;  %v1033_v55 = vrot.slane %v485_v53, 2  ;;  %v1036_v56 = vrot.slane %v497_v3, 1  ;;  %v1037_v57 = vrot.slane %v493_v62, 2 }
  0x2d   : > { %1690 = vmatprep.subr.bf16.mxu1 %v1858_v23  ;;  %v520_v30 = vsel %vm452_vm2, %v515_v46, %v519_v47  ;;  %v1030_v51 = vor.u32 %v1029_v50, %v1028_v45  ;;  %v1027_v49 = vsel %vm1011_vm3, %v1022_v38, %v1026_v29  ;;  %v1041_v60 = vrot.slane %v501_v7, 2 }
  0x2e   : > { %1725 = vmatmul.mubr.msk.bf16.gmra.mrb[8].mxu0 %vm345_vm0, %v835_v17  ;;  %v1034_v59 = vor.u32 %v1033_v55, %v1032_v52  ;;  %v1038_v58 = vor.u32 %v1037_v57, %v1036_v56  ;;  %v1044_v63 = vrot.slane %v513_v28, 1  ;;  %v1045_v0 = vrot.slane %v509_v22, 2 }
  0x2f   : > { %1728 = vmatprep.mubr.msk.bf16.mxu0 %vm345_vm0, %v837_v25  ;;  %v1031_v40 = vsel %vm1011_vm3, %v1026_v29, %v1030_v51  ;;  %v1049_v2 = vshrl.u32 %v1001_v1, 16  ;;  %v1052_v3 = vshll.u32 %v1001_v1, 16 }
  0x30   : > { %1691 = vmatpush3.bf16.msra.mxu1 %v1858_v23  ;;  %v1035_v53 = vsel %vm1011_vm3, %v1030_v51, %v1034_v59  ;;  %v1039_v62 = vsel %vm1011_vm3, %v1034_v59, %v1038_v58  ;;  %v1046_v4 = vor.u32 %v1045_v0, %v1044_v63 }
  0x31   : > { %v1051_v6 = vrot.slane %v1049_v2, 1 }
  0x33   : > { %1677 = vmatmul.mubr.msk.bf16.gmra.mrb[8].mxu1 %vm345_vm0, %v504_v33 }
  0x34   : > { %1680 = vmatprep.mubr.msk.bf16.mxu1 %vm345_vm0, %v512_v41 }
  0x36   : > { %1729 = vmatmul.mubr.msk.bf16.gmra.mrb[12].mxu0 %vm345_vm0, %v839_v44 }
  0x37   : > { %1740 = vmatprep.mubr.msk.bf16.mxu0 %vm345_vm0, %v1023_v48 }
  0x3b   : > { %1681 = vmatmul.mubr.msk.bf16.gmra.mrb[12].mxu1 %vm345_vm0, %v520_v30 }
  0x3c   : > { %1692 = vmatprep.mubr.msk.bf16.mxu1 %vm345_vm0, %v1985_v18  ;;  %v1040_v18 = vrot.slane %v505_v11, 1 }
  0x3e   : > { %1741 = vmatmul.mubr.msk.bf16.vlgmr.msra.gmra.mrb[0].mxu0 %vm345_vm0, %v1027_v49 }
  0x3f   : > { %1744 = vmatprep.mubr.msk.bf16.mxu0 %vm345_vm0, %v1031_v40 }
  0x43   : > { %1693 = vmatmul.mubr.msk.bf16.vlgmr.msra.gmra.mrb[0].mxu1 %vm345_vm0, %v1981_v16  ;;  %v1042_v16 = vor.u32 %v1041_v60, %v1040_v18 }
  0x44   : > { %1696 = vmatprep.mubr.msk.bf16.mxu1 %vm345_vm0, %v1989_v21  ;;  %v1054_v21 = vrot.slane %v1052_v3, 2 }
  0x45   : > { %v1043_v5 = vsel %vm1011_vm3, %v1038_v58, %v1042_v16  ;;  %v1047_v7 = vsel %vm1011_vm3, %v1042_v16, %v1046_v4 }
  0x46   : > { %1745 = vmatmul.mubr.msk.bf16.gmra.mrb[4].mxu0 %vm345_vm0, %v1035_v53  ;;  %v1055_v8 = vor.u32 %v1054_v21, %v1051_v6 }
  0x47   : > { %1748 = vmatprep.mubr.msk.bf16.mxu0 %vm345_vm0, %v1039_v62 }
  0x4b   : > { %1697 = vmatmul.mubr.msk.bf16.gmra.mrb[4].mxu1 %vm345_vm0, %v2009_v35  ;;  %v1056_v35 = vsel %vm1011_vm3, %v1046_v4, %v1055_v8 }
  0x4c   : > { %1700 = vmatprep.mubr.msk.bf16.mxu1 %vm345_vm0, %v2016_v39 }
  0x4e   : > { %1749 = vmatmul.mubr.msk.bf16.gmra.mrb[8].mxu0 %vm345_vm0, %v1043_v5 }
  0x4f   : > { %1752 = vmatprep.mubr.msk.bf16.mxu0 %vm345_vm0, %v1047_v7 }
  0x53   : > { %1701 = vmatmul.mubr.msk.bf16.gmra.mrb[8].mxu1 %vm345_vm0, %v2043_v54  ;;  %v2173_v54 = vld [vmem:[%s2217_s3] ss:$0 sm:$0xff] }
  0x54   : > { %1704 = vmatprep.mubr.msk.bf16.mxu1 %vm345_vm0, %v2058_v61 }
  0x56   : > { %1753 = vmatmul.mubr.msk.bf16.gmra.mrb[12].mxu0 %vm345_vm0, %v1056_v35 }
  0x5b   : > { %1705 = vmatmul.mubr.msk.bf16.gmra.mrb[12].mxu1 %vm345_vm0, %v2087_v13 }
 0x111   : > { %v1742_v39 = vpop.f32.mrb[0].mxu0 }
 0x112   : > { %v1139_v9 = vpop.f32.mrb[1].mxu0 }
 0x113   : > { %v1743_v10 = vpop.f32.mrb[2].mxu0 }
 0x114   : > { %v1142_v11 = vpop.f32.mrb[3].mxu0 }
 0x116   : > { %v1694_v12 = vpop.f32.mrb[0].mxu1 }
 0x117   : > { %v1756_v14 = vadd.f32 %v1742_v39, %v1694_v12  ;;  %v740_v15 = vpop.f32.mrb[1].mxu1 }
 0x118   : > { %v1757_v17 = vadd.f32 %v1139_v9, %v740_v15  ;;  %v1695_v19 = vpop.f32.mrb[2].mxu1 }
 0x119   : > { %v1758_v61 = vadd.f32 %v1743_v10, %v1695_v19  ;;  %v743_v20 = vpop.f32.mrb[3].mxu1  ;;  %v1746_v22 = vpop.f32.mrb[4].mxu0  ;;  %v1227_v24 = vadd.f32 %v1756_v14, %v2173_v54 }
 0x11a   : > { %v1759_v23 = vadd.f32 %v1142_v11, %v743_v20  ;;  %v1155_v13 = vpop.f32.mrb[5].mxu0  ;;  %v1225_v27 = vadd.f32 %v1757_v17, %v2173_v54 }
 0x11b   : > { %v1228_v25 = vadd.f32 %v1758_v61, %v2173_v54  ;;  %v1747_v26 = vpop.f32.mrb[6].mxu0 }
 0x11c   : > { %v1226_v31 = vadd.f32 %v1759_v23, %v2173_v54  ;;  %v1158_v32 = vpop.f32.mrb[7].mxu0 }
 0x11d   : > { %v1572_v33 = vpack.c.bf16 %v1228_v25, %v1227_v24 }
 0x11e   : > { %v1567_v34 = vpack.c.bf16 %v1226_v31, %v1225_v27  ;;  %v1698_v28 = vpop.f32.mrb[4].mxu1 }
 0x11f   : > { %1605 = vst [vmem:[%s2182_s20 + $0x8] sm:$0xff] %v1572_v33   ;;  %v1760_v36 = vadd.f32 %v1746_v22, %v1698_v28  ;;  %v756_v37 = vpop.f32.mrb[5].mxu1 }
 0x120   : > { %1568 = vst [vmem:[%s2182_s20] sm:$0xff] %v1567_v34   ;;  %v1761_v38 = vadd.f32 %v1155_v13, %v756_v37  ;;  %v1699_v41 = vpop.f32.mrb[6].mxu1 }
 0x121   : > { %v1762_v42 = vadd.f32 %v1747_v26, %v1699_v41  ;;  %v759_v43 = vpop.f32.mrb[7].mxu1  ;;  %v1750_v44 = vpop.f32.mrb[8].mxu0  ;;  %v1231_v47 = vadd.f32 %v1760_v36, %v2173_v54 }
 0x122   : > { %v1763_v45 = vadd.f32 %v1158_v32, %v759_v43  ;;  %v1171_v46 = vpop.f32.mrb[9].mxu0  ;;  %v1229_v29 = vadd.f32 %v1761_v38, %v2173_v54 }
 0x123   : > { %v1232_v48 = vadd.f32 %v1762_v42, %v2173_v54  ;;  %v1751_v50 = vpop.f32.mrb[10].mxu0 }
 0x124   : > { %v1230_v30 = vadd.f32 %v1763_v45, %v2173_v54  ;;  %v1174_v51 = vpop.f32.mrb[11].mxu0 }
 0x125   : > { %v1582_v49 = vpack.c.bf16 %v1232_v48, %v1231_v47 }
 0x126   : > { %v1577_v52 = vpack.c.bf16 %v1230_v30, %v1229_v29  ;;  %v1702_v55 = vpop.f32.mrb[8].mxu1 }
 0x127   : > { %1607 = vst [vmem:[%s2182_s20 + $0x18] sm:$0xff] %v1582_v49   ;;  %v1764_v40 = vadd.f32 %v1750_v44, %v1702_v55  ;;  %v772_v56 = vpop.f32.mrb[9].mxu1 }
 0x128   : > { %1606 = vst [vmem:[%s2182_s20 + $0x10] sm:$0xff] %v1577_v52   ;;  %v1765_v57 = vadd.f32 %v1171_v46, %v772_v56  ;;  %v1703_v59 = vpop.f32.mrb[10].mxu1 }
 0x129   : > { %v1766_v58 = vadd.f32 %v1751_v50, %v1703_v59  ;;  %v775_v53 = vpop.f32.mrb[11].mxu1  ;;  %v1754_v18 = vpop.f32.mrb[12].mxu0  ;;  %v1235_v63 = vadd.f32 %v1764_v40, %v2173_v54 }
 0x12a   : > { %v1767_v60 = vadd.f32 %v1174_v51, %v775_v53  ;;  %v1187_v62 = vpop.f32.mrb[13].mxu0  ;;  %v1233_v16 = vadd.f32 %v1765_v57, %v2173_v54 }
 0x12b   : > { %v1236_v0 = vadd.f32 %v1766_v58, %v2173_v54  ;;  %v1755_v1 = vpop.f32.mrb[14].mxu0 }
 0x12c   : > { %v1234_v2 = vadd.f32 %v1767_v60, %v2173_v54  ;;  %v1190_v3 = vpop.f32.mrb[15].mxu0 }
 0x12d   : > { %v1592_v4 = vpack.c.bf16 %v1236_v0, %v1235_v63 }
 0x12e   : > { %v1587_v5 = vpack.c.bf16 %v1234_v2, %v1233_v16  ;;  %v1706_v6 = vpop.f32.mrb[12].mxu1 }
 0x12f   : > { %1609 = vst [vmem:[%s2182_s20 + $0x28] sm:$0xff] %v1592_v4   ;;  %v1768_v21 = vadd.f32 %v1754_v18, %v1706_v6  ;;  %v788_v7 = vpop.f32.mrb[13].mxu1 }
 0x130   : > { %1608 = vst [vmem:[%s2182_s20 + $0x20] sm:$0xff] %v1587_v5   ;;  %v1769_v8 = vadd.f32 %v1187_v62, %v788_v7  ;;  %v1707_v35 = vpop.f32.mrb[14].mxu1 }
 0x131   : > { %v1770_v39 = vadd.f32 %v1755_v1, %v1707_v35  ;;  %v791_v9 = vpop.f32.mrb[15].mxu1  ;;  %v1239_v11 = vadd.f32 %v1768_v21, %v2173_v54 }
 0x132   : > { %v1771_v10 = vadd.f32 %v1190_v3, %v791_v9  ;;  %v1237_v14 = vadd.f32 %v1769_v8, %v2173_v54 }
 0x133   : > { %v1240_v12 = vadd.f32 %v1770_v39, %v2173_v54 }
 0x134   : > { %v1238_v15 = vadd.f32 %v1771_v10, %v2173_v54 }
 0x135   : > { %v1602_v17 = vpack.c.bf16 %v1240_v12, %v1239_v11 }
 0x136   : > { %v1597_v19 = vpack.c.bf16 %v1238_v15, %v1237_v14 }
 0x137   : > { %1611 = vst [vmem:[%s2182_s20 + $0x38] sm:$0xff] %v1602_v17  }
 0x138   : > { %1610 = vst [vmem:[%s2182_s20 + $0x30] sm:$0xff] %v1597_v19  }
 0x139 PF: > { %s14_s17 = sadd.s32 1, %s1882_s17   ;;  %s2219_s15 = smov %s1878_s16 }
 0x13a   : > { %p11_p5 = scmp.ge.s32.totalorder %s14_s17, 4   ;;  %s2220_s16 = smov %s2222_s18 }
 0x13c   :  { %13 = sbr.rel (!%p11_p5) target bundleno = 2 (0x2), region = 72 }

</bundles_post_ra>
